<compile_context>
chip_gen: v6e
topology: v6e:2x2x1
jax: 0.10.0
libtpu: 0.0.40
codegen_flags: <defaults>
</compile_context>

<pallas_src>
import math

import jax
import jax.numpy as jnp
from jax.experimental import pallas as pl
from jax.experimental.pallas import tpu as pltpu


def init_kernels(h, N):
    # TODO(synk): torch init_kernels/weights_init are not given in the spec;
    # deterministic per-head decaying spectrum stand-in, shape (h, 1, 1, N).
    n = jnp.arange(N, dtype=jnp.float32)
    heads = jnp.arange(1, h + 1, dtype=jnp.float32)[:, None]
    amps = jnp.exp(-n[None, :] / (4.0 * heads)) / float(N)
    return amps.reshape(h, 1, 1, N)


def _pick_sk_tile(sk, max_tile=512):
    """Largest multiple-of-8 divisor of sk that is <= max_tile (or full sk)."""
    if sk <= max_tile:
        return sk
    t = (max_tile // 8) * 8
    while t >= 8:
        if sk % t == 0:
            return t
        t -= 8
    return sk


def _make_kernel(h, d, N):
    def kernel(freqs_ref, ra_ref, ia_ref, k_ref, q_ref, v_ref, o_ref, kv_acc):
        sk_idx = pl.program_id(1)
        n_sk = pl.num_programs(1)

        freqs = freqs_ref[...]                 # (1, N)   shared across heads
        k = k_ref[0]                           # (tsk, h) seq on sublanes
        v = v_ref[0]                           # (tsk, h*d)

        # ---- key side: per-head 2N feature map contracted against values ----
        # (folded 4N -> 2N; kv tiles lane-packed over heads into (2N, h*d))
        kv_tiles = []
        for hh in range(h):                    # h is small & static -> unroll
            pk = k[:, hh:hh + 1] * freqs                              # (tsk, N)
            tk = jnp.concatenate([jnp.cos(pk), jnp.sin(pk)], -1)      # (tsk, 2N)
            v_h = v[:, hh * d:(hh + 1) * d]                           # (tsk, d)
            kv_tiles.append(jax.lax.dot_general(
                tk, v_h, (((0,), (0,)), ((), ())),
                preferred_element_type=jnp.float32))                  # (2N, d)
        kv_tile = jnp.concatenate(kv_tiles, -1)                       # (2N, h*d)

        @pl.when(sk_idx == 0)
        def _():
            kv_acc[...] = jnp.zeros_like(kv_acc)

        kv_acc[...] += kv_tile

        # ---- query side + finalize: only on the last Sk tile of this batch ----
        @pl.when(sk_idx == n_sk - 1)
        def _():
            q = q_ref[0]                       # (Sq, h)
            ra = ra_ref[...]                   # (h, N)
            ia = ia_ref[...]                   # (h, N)
            outs = []
            for hh in range(h):
                pq = q[:, hh:hh + 1] * freqs                          # (Sq, N)
                cq = jnp.cos(pq)
                sq = jnp.sin(pq)
                ra_h = ra[hh:hh + 1, :]                               # (1, N)
                ia_h = ia[hh:hh + 1, :]
                tq = jnp.concatenate(
                    [ra_h * cq + ia_h * sq, ra_h * sq - ia_h * cq], -1)  # (Sq, 2N)
                kv_h = kv_acc[:, hh * d:(hh + 1) * d]                    # (2N, d)
                outs.append(jnp.dot(tq, kv_h,
                                    preferred_element_type=jnp.float32))  # (Sq, d)
            # one lane-dense (Sq, h*d) store -> dense HBM writeback of the block
            o_ref[0] = jnp.concatenate(outs, -1).astype(o_ref.dtype)

    return kernel


def fourier_kernel_attention(key, value, query, real_amps, imag_amps, freqs,
                             h, num_hidden, N, sk_block=None):
    """JAX/Pallas equivalent of FourierKernelAttention.forward."""
    B, Sk, _ = key.shape
    Sq = query.shape[1]
    d = num_hidden // h

    tsk = sk_block if sk_block is not None else _pick_sk_tile(Sk)
    assert Sk % tsk == 0, (Sk, tsk)
    n_sk = Sk // tsk

    # Parameter-only reshapes (tiny); the big tensors keep their HBM layout.
    fr = freqs.reshape(h, N)[0:1].astype(jnp.float32)   # identical per head
    ra = real_amps.reshape(h, N).astype(jnp.float32)
    ia = imag_amps.reshape(h, N).astype(jnp.float32)

    out = pl.pallas_call(
        _make_kernel(h, d, N),
        out_shape=jax.ShapeDtypeStruct((B, Sq, num_hidden), jnp.float32),
        grid=(B, n_sk),                                  # reduction axis last
        in_specs=[
            pl.BlockSpec((1, N), lambda b, s: (0, 0)),                 # freqs
            pl.BlockSpec((h, N), lambda b, s: (0, 0)),                 # real amps
            pl.BlockSpec((h, N), lambda b, s: (0, 0)),                 # imag amps
            pl.BlockSpec((1, tsk, h), lambda b, s: (b, s, 0)),         # key
            pl.BlockSpec((1, Sq, h), lambda b, s: (b, 0, 0)),          # query
            pl.BlockSpec((1, tsk, num_hidden), lambda b, s: (b, s, 0)),  # value
        ],
        out_specs=pl.BlockSpec((1, Sq, num_hidden), lambda b, s: (b, 0, 0)),
        scratch_shapes=[pltpu.VMEM((2 * N, num_hidden), jnp.float32)],  # kv acc
        compiler_params=pltpu.CompilerParams(
            dimension_semantics=("parallel", "arbitrary")),
    )(fr, ra, ia, key.astype(jnp.float32), query.astype(jnp.float32),
      value.astype(jnp.float32))

    return out


def fka_reference(key, value, query, real_amps, imag_amps, freqs, h, num_hidden, N):
    """Plain-JAX reference mirroring the PyTorch forward exactly (4N path)."""
    B, Sk, _ = key.shape
    Sq = query.shape[1]
    d = num_hidden // h
    k = key.reshape(B, Sk, h, 1).transpose(2, 0, 1, 3)              # (h,B,Sk,1)
    q = query.reshape(B, Sq, h, 1).transpose(2, 0, 1, 3)            # (h,B,Sq,1)
    v = value.reshape(B, Sk, h, d).transpose(2, 0, 1, 3).reshape(-1, Sk, d)
    qp = freqs * q
    kp = freqs * k
    sin_q, cos_q = jnp.sin(qp), jnp.cos(qp)
    sin_k, cos_k = jnp.sin(kp), jnp.cos(kp)
    tq = jnp.concatenate([real_amps * cos_q, real_amps * sin_q,
                          imag_amps * sin_q, -imag_amps * cos_q], -1)
    tk = jnp.concatenate([cos_k, sin_k, cos_k, sin_k], -1)
    tq = tq.reshape(-1, Sq, 4 * N)
    tk = tk.reshape(-1, Sk, 4 * N)
    kv = jnp.einsum('bkn,bkd->bnd', tk, v)
    out = jnp.einsum('bqn,bnd->bqd', tq, kv)
    return out.reshape(h, B, Sq, d).transpose(1, 2, 0, 3).reshape(B, Sq, -1)


if __name__ == "__main__":
    B, S, h, num_hidden, N = 2, 8, 4, 32, 32

    rng = jax.random.PRNGKey(0)
    k1, k2, k3 = jax.random.split(rng, 3)
    key_in = jax.random.normal(k1, (B, S, h), dtype=jnp.float32)
    value_in = jax.random.normal(k2, (B, S, num_hidden), dtype=jnp.float32)
    query_in = jax.random.normal(k3, (B, S, h), dtype=jnp.float32)

    # Parameters (deterministic, matching module __init__ shapes).  imag_amps
    # is made non-zero here so the folded imaginary path is actually exercised.
    real_amps = init_kernels(h, N)                                   # (h,1,1,N)
    imag_amps = 0.5 * init_kernels(h, N) * jnp.linspace(-1.0, 1.0, N)
    # get_freqs: arange(0, 1+step, step=1/(N-1)) * N * pi == linspace(0,1,N)*N*pi
    freqs_1d = (jnp.linspace(0.0, 1.0, N) * N * math.pi).astype(jnp.float32)
    freqs = jnp.broadcast_to(freqs_1d[None, None, None, :], (h, 1, 1, N))

    out = fourier_kernel_attention(key_in, value_in, query_in,
                                   real_amps, imag_amps, freqs,
                                   h, num_hidden, N)
    out = jax.block_until_ready(out)

    ref = fka_reference(key_in, value_in, query_in,
                        real_amps, imag_amps, freqs, h, num_hidden, N)
    assert out.shape == (B, S, num_hidden), out.shape
    err = float(jnp.max(jnp.abs(out - ref)))
    assert jnp.allclose(out, ref, atol=2e-4, rtol=2e-4), err
    print("KERNEL_OK")
</pallas_src>

<mosaic_0001>
module attributes {stable_mosaic.version = 11 : i64} {
  func.func @kernel(%arg0: i32, %arg1: i32, %arg2: memref<1x32xf32, #tpu.memory_space<vmem>>, %arg3: memref<4x32xf32, #tpu.memory_space<vmem>>, %arg4: memref<4x32xf32, #tpu.memory_space<vmem>>, %arg5: memref<1x8x4xf32, #tpu.memory_space<vmem>>, %arg6: memref<1x8x4xf32, #tpu.memory_space<vmem>>, %arg7: memref<1x8x32xf32, #tpu.memory_space<vmem>>, %arg8: memref<1x8x32xf32, #tpu.memory_space<vmem>>, %arg9: memref<64x32xf32, #tpu.memory_space<vmem>>) attributes {dimension_semantics = [#tpu.dimension_semantics<parallel>, #tpu.dimension_semantics<arbitrary>], iteration_bounds = array<i64: 2, 1>, scalar_prefetch = 0 : i64, scratch_operands = 1 : i64, tpu.core_type = #tpu.core_type<tc>, window_params = [{pipeline_mode = #tpu.pipeline_mode<synchronous>, transform_indices = @transform_0, window_bounds = array<i64: 1, 32>}, {pipeline_mode = #tpu.pipeline_mode<synchronous>, transform_indices = @transform_1, window_bounds = array<i64: 4, 32>}, {pipeline_mode = #tpu.pipeline_mode<synchronous>, transform_indices = @transform_2, window_bounds = array<i64: 4, 32>}, {transform_indices = @transform_3, window_bounds = array<i64: 1, 8, 4>}, {transform_indices = @transform_4, window_bounds = array<i64: 1, 8, 4>}, {transform_indices = @transform_5, window_bounds = array<i64: 1, 8, 32>}, {transform_indices = @transform_6, window_bounds = array<i64: 1, 8, 32>}]} {
    %c0 = arith.constant 0 : index
    %c0_0 = arith.constant 0 : index
    %0 = vector.load %arg2[%c0, %c0_0] : memref<1x32xf32, #tpu.memory_space<vmem>>, vector<1x32xf32>
    %c0_1 = arith.constant 0 : index
    %c0_2 = arith.constant 0 : index
    %c0_3 = arith.constant 0 : index
    %1 = vector.load %arg5[%c0_1, %c0_2, %c0_3] : memref<1x8x4xf32, #tpu.memory_space<vmem>>, vector<1x8x4xf32>
    %2 = vector.shape_cast %1 : vector<1x8x4xf32> to vector<8x4xf32>
    %c0_4 = arith.constant 0 : index
    %c0_5 = arith.constant 0 : index
    %c0_6 = arith.constant 0 : index
    %3 = vector.load %arg7[%c0_4, %c0_5, %c0_6] : memref<1x8x32xf32, #tpu.memory_space<vmem>>, vector<1x8x32xf32>
    %4 = vector.shape_cast %3 : vector<1x8x32xf32> to vector<8x32xf32>
    %5 = vector.extract_strided_slice %2 {offsets = [0, 0], sizes = [8, 1], strides = [1, 1]} : vector<8x4xf32> to vector<8x1xf32>
    %6 = vector.broadcast %5 : vector<8x1xf32> to vector<8x32xf32>
    %7 = vector.broadcast %0 : vector<1x32xf32> to vector<8x32xf32>
    %8 = arith.mulf %6, %7 : vector<8x32xf32>
    %9 = math.cos %8 : vector<8x32xf32>
    %10 = math.sin %8 : vector<8x32xf32>
    %11 = tpu.concatenate %9, %10 in 1 : vector<8x32xf32>, vector<8x32xf32> -> vector<8x64xf32>
    %12 = vector.extract_strided_slice %4 {offsets = [0, 0], sizes = [8, 8], strides = [1, 1]} : vector<8x32xf32> to vector<8x8xf32>
    %cst = arith.constant dense<0.000000e+00> : vector<64x8xf32>
    %13 = tpu.matmul %11, %12, %cst {dimension_numbers = #tpu.dot_dimension_numbers<[0], [0], [1], [1], [0, 1, 1, 1], [], []>} : vector<8x64xf32>, vector<8x8xf32>, vector<64x8xf32> -> vector<64x8xf32>
    %14 = vector.extract_strided_slice %2 {offsets = [0, 1], sizes = [8, 1], strides = [1, 1]} : vector<8x4xf32> to vector<8x1xf32>
    %15 = vector.broadcast %14 : vector<8x1xf32> to vector<8x32xf32>
    %16 = vector.broadcast %0 : vector<1x32xf32> to vector<8x32xf32>
    %17 = arith.mulf %15, %16 : vector<8x32xf32>
    %18 = math.cos %17 : vector<8x32xf32>
    %19 = math.sin %17 : vector<8x32xf32>
    %20 = tpu.concatenate %18, %19 in 1 : vector<8x32xf32>, vector<8x32xf32> -> vector<8x64xf32>
    %21 = vector.extract_strided_slice %4 {offsets = [0, 8], sizes = [8, 8], strides = [1, 1]} : vector<8x32xf32> to vector<8x8xf32>
    %cst_7 = arith.constant dense<0.000000e+00> : vector<64x8xf32>
    %22 = tpu.matmul %20, %21, %cst_7 {dimension_numbers = #tpu.dot_dimension_numbers<[0], [0], [1], [1], [0, 1, 1, 1], [], []>} : vector<8x64xf32>, vector<8x8xf32>, vector<64x8xf32> -> vector<64x8xf32>
    %23 = vector.extract_strided_slice %2 {offsets = [0, 2], sizes = [8, 1], strides = [1, 1]} : vector<8x4xf32> to vector<8x1xf32>
    %24 = vector.broadcast %23 : vector<8x1xf32> to vector<8x32xf32>
    %25 = vector.broadcast %0 : vector<1x32xf32> to vector<8x32xf32>
    %26 = arith.mulf %24, %25 : vector<8x32xf32>
    %27 = math.cos %26 : vector<8x32xf32>
    %28 = math.sin %26 : vector<8x32xf32>
    %29 = tpu.concatenate %27, %28 in 1 : vector<8x32xf32>, vector<8x32xf32> -> vector<8x64xf32>
    %30 = vector.extract_strided_slice %4 {offsets = [0, 16], sizes = [8, 8], strides = [1, 1]} : vector<8x32xf32> to vector<8x8xf32>
    %cst_8 = arith.constant dense<0.000000e+00> : vector<64x8xf32>
    %31 = tpu.matmul %29, %30, %cst_8 {dimension_numbers = #tpu.dot_dimension_numbers<[0], [0], [1], [1], [0, 1, 1, 1], [], []>} : vector<8x64xf32>, vector<8x8xf32>, vector<64x8xf32> -> vector<64x8xf32>
    %32 = vector.extract_strided_slice %2 {offsets = [0, 3], sizes = [8, 1], strides = [1, 1]} : vector<8x4xf32> to vector<8x1xf32>
    %33 = vector.broadcast %32 : vector<8x1xf32> to vector<8x32xf32>
    %34 = vector.broadcast %0 : vector<1x32xf32> to vector<8x32xf32>
    %35 = arith.mulf %33, %34 : vector<8x32xf32>
    %36 = math.cos %35 : vector<8x32xf32>
    %37 = math.sin %35 : vector<8x32xf32>
    %38 = tpu.concatenate %36, %37 in 1 : vector<8x32xf32>, vector<8x32xf32> -> vector<8x64xf32>
    %39 = vector.extract_strided_slice %4 {offsets = [0, 24], sizes = [8, 8], strides = [1, 1]} : vector<8x32xf32> to vector<8x8xf32>
    %cst_9 = arith.constant dense<0.000000e+00> : vector<64x8xf32>
    %40 = tpu.matmul %38, %39, %cst_9 {dimension_numbers = #tpu.dot_dimension_numbers<[0], [0], [1], [1], [0, 1, 1, 1], [], []>} : vector<8x64xf32>, vector<8x8xf32>, vector<64x8xf32> -> vector<64x8xf32>
    %41 = tpu.concatenate %13, %22, %31, %40 in 1 : vector<64x8xf32>, vector<64x8xf32>, vector<64x8xf32>, vector<64x8xf32> -> vector<64x32xf32>
    %c0_i32 = arith.constant 0 : i32
    %42 = arith.cmpi eq, %arg1, %c0_i32 : i32
    %43 = arith.extui %42 : i1 to i32
    %c0_i32_10 = arith.constant 0 : i32
    %44 = arith.cmpi ne, %43, %c0_i32_10 : i32
    scf.if %44 {
      %cst_17 = arith.constant 0.000000e+00 : f32
      %51 = vector.broadcast %cst_17 : f32 to vector<64x32xf32>
      %c0_18 = arith.constant 0 : index
      %c0_19 = arith.constant 0 : index
      %52 = vector.load %arg9[%c0_18, %c0_19] : memref<64x32xf32, #tpu.memory_space<vmem>>, vector<64x32xf32>
      tpu.vector_store %arg9[%c0_18, %c0_19], %51 {strides = array<i32>} : memref<64x32xf32, #tpu.memory_space<vmem>>, vector<64x32xf32>,
    } else {
    }
    %c0_11 = arith.constant 0 : index
    %c0_12 = arith.constant 0 : index
    %45 = vector.load %arg9[%c0_11, %c0_12] : memref<64x32xf32, #tpu.memory_space<vmem>>, vector<64x32xf32>
    %46 = arith.addf %45, %41 : vector<64x32xf32>
    %c0_13 = arith.constant 0 : index
    %c0_14 = arith.constant 0 : index
    %47 = vector.load %arg9[%c0_13, %c0_14] : memref<64x32xf32, #tpu.memory_space<vmem>>, vector<64x32xf32>
    tpu.vector_store %arg9[%c0_13, %c0_14], %46 {strides = array<i32>} : memref<64x32xf32, #tpu.memory_space<vmem>>, vector<64x32xf32>,
    %c0_i32_15 = arith.constant 0 : i32
    %48 = arith.cmpi eq, %arg1, %c0_i32_15 : i32
    %49 = arith.extui %48 : i1 to i32
    %c0_i32_16 = arith.constant 0 : i32
    %50 = arith.cmpi ne, %49, %c0_i32_16 : i32
    scf.if %50 {
      %c0_17 = arith.constant 0 : index
      %c0_18 = arith.constant 0 : index
      %c0_19 = arith.constant 0 : index
      %51 = vector.load %arg6[%c0_17, %c0_18, %c0_19] : memref<1x8x4xf32, #tpu.memory_space<vmem>>, vector<1x8x4xf32>
      %52 = vector.shape_cast %51 : vector<1x8x4xf32> to vector<8x4xf32>
      %c0_20 = arith.constant 0 : index
      %c0_21 = arith.constant 0 : index
      %53 = vector.load %arg3[%c0_20, %c0_21] : memref<4x32xf32, #tpu.memory_space<vmem>>, vector<4x32xf32>
      %c0_22 = arith.constant 0 : index
      %c0_23 = arith.constant 0 : index
      %54 = vector.load %arg4[%c0_22, %c0_23] : memref<4x32xf32, #tpu.memory_space<vmem>>, vector<4x32xf32>
      %55 = vector.extract_strided_slice %52 {offsets = [0, 0], sizes = [8, 1], strides = [1, 1]} : vector<8x4xf32> to vector<8x1xf32>
      %56 = vector.broadcast %55 : vector<8x1xf32> to vector<8x32xf32>
      %57 = vector.broadcast %0 : vector<1x32xf32> to vector<8x32xf32>
      %58 = arith.mulf %56, %57 : vector<8x32xf32>
      %59 = math.cos %58 : vector<8x32xf32>
      %60 = math.sin %58 : vector<8x32xf32>
      %61 = vector.extract_strided_slice %53 {offsets = [0, 0], sizes = [1, 32], strides = [1, 1]} : vector<4x32xf32> to vector<1x32xf32>
      %62 = vector.extract_strided_slice %54 {offsets = [0, 0], sizes = [1, 32], strides = [1, 1]} : vector<4x32xf32> to vector<1x32xf32>
      %63 = vector.broadcast %61 : vector<1x32xf32> to vector<8x32xf32>
      %64 = arith.mulf %63, %59 : vector<8x32xf32>
      %65 = vector.broadcast %62 : vector<1x32xf32> to vector<8x32xf32>
      %66 = arith.mulf %65, %60 : vector<8x32xf32>
      %67 = arith.addf %64, %66 : vector<8x32xf32>
      %68 = vector.broadcast %61 : vector<1x32xf32> to vector<8x32xf32>
      %69 = arith.mulf %68, %60 : vector<8x32xf32>
      %70 = vector.broadcast %62 : vector<1x32xf32> to vector<8x32xf32>
      %71 = arith.mulf %70, %59 : vector<8x32xf32>
      %72 = arith.subf %69, %71 : vector<8x32xf32>
      %73 = tpu.concatenate %67, %72 in 1 : vector<8x32xf32>, vector<8x32xf32> -> vector<8x64xf32>
      %c0_24 = arith.constant 0 : index
      %c0_25 = arith.constant 0 : index
      %74 = vector.load %arg9[%c0_24, %c0_25] : memref<64x32xf32, #tpu.memory_space<vmem>>, vector<64x8xf32>
      %cst_26 = arith.constant dense<0.000000e+00> : vector<8x8xf32>
      %75 = tpu.matmul %73, %74, %cst_26 {dimension_numbers = #tpu.dot_dimension_numbers<[1], [0], [0], [1], [0, 0, 1, 1], [], []>} : vector<8x64xf32>, vector<64x8xf32>, vector<8x8xf32> -> vector<8x8xf32>
      %76 = vector.extract_strided_slice %52 {offsets = [0, 1], sizes = [8, 1], strides = [1, 1]} : vector<8x4xf32> to vector<8x1xf32>
      %77 = vector.broadcast %76 : vector<8x1xf32> to vector<8x32xf32>
      %78 = vector.broadcast %0 : vector<1x32xf32> to vector<8x32xf32>
      %79 = arith.mulf %77, %78 : vector<8x32xf32>
      %80 = math.cos %79 : vector<8x32xf32>
      %81 = math.sin %79 : vector<8x32xf32>
      %82 = vector.extract_strided_slice %53 {offsets = [1, 0], sizes = [1, 32], strides = [1, 1]} : vector<4x32xf32> to vector<1x32xf32>
      %83 = vector.extract_strided_slice %54 {offsets = [1, 0], sizes = [1, 32], strides = [1, 1]} : vector<4x32xf32> to vector<1x32xf32>
      %84 = vector.broadcast %82 : vector<1x32xf32> to vector<8x32xf32>
      %85 = arith.mulf %84, %80 : vector<8x32xf32>
      %86 = vector.broadcast %83 : vector<1x32xf32> to vector<8x32xf32>
      %87 = arith.mulf %86, %81 : vector<8x32xf32>
      %88 = arith.addf %85, %87 : vector<8x32xf32>
      %89 = vector.broadcast %82 : vector<1x32xf32> to vector<8x32xf32>
      %90 = arith.mulf %89, %81 : vector<8x32xf32>
      %91 = vector.broadcast %83 : vector<1x32xf32> to vector<8x32xf32>
      %92 = arith.mulf %91, %80 : vector<8x32xf32>
      %93 = arith.subf %90, %92 : vector<8x32xf32>
      %94 = tpu.concatenate %88, %93 in 1 : vector<8x32xf32>, vector<8x32xf32> -> vector<8x64xf32>
      %c0_27 = arith.constant 0 : index
      %c8 = arith.constant 8 : index
      %95 = vector.load %arg9[%c0_27, %c8] : memref<64x32xf32, #tpu.memory_space<vmem>>, vector<64x8xf32>
      %cst_28 = arith.constant dense<0.000000e+00> : vector<8x8xf32>
      %96 = tpu.matmul %94, %95, %cst_28 {dimension_numbers = #tpu.dot_dimension_numbers<[1], [0], [0], [1], [0, 0, 1, 1], [], []>} : vector<8x64xf32>, vector<64x8xf32>, vector<8x8xf32> -> vector<8x8xf32>
      %97 = vector.extract_strided_slice %52 {offsets = [0, 2], sizes = [8, 1], strides = [1, 1]} : vector<8x4xf32> to vector<8x1xf32>
      %98 = vector.broadcast %97 : vector<8x1xf32> to vector<8x32xf32>
      %99 = vector.broadcast %0 : vector<1x32xf32> to vector<8x32xf32>
      %100 = arith.mulf %98, %99 : vector<8x32xf32>
      %101 = math.cos %100 : vector<8x32xf32>
      %102 = math.sin %100 : vector<8x32xf32>
      %103 = vector.extract_strided_slice %53 {offsets = [2, 0], sizes = [1, 32], strides = [1, 1]} : vector<4x32xf32> to vector<1x32xf32>
      %104 = vector.extract_strided_slice %54 {offsets = [2, 0], sizes = [1, 32], strides = [1, 1]} : vector<4x32xf32> to vector<1x32xf32>
      %105 = vector.broadcast %103 : vector<1x32xf32> to vector<8x32xf32>
      %106 = arith.mulf %105, %101 : vector<8x32xf32>
      %107 = vector.broadcast %104 : vector<1x32xf32> to vector<8x32xf32>
      %108 = arith.mulf %107, %102 : vector<8x32xf32>
      %109 = arith.addf %106, %108 : vector<8x32xf32>
      %110 = vector.broadcast %103 : vector<1x32xf32> to vector<8x32xf32>
      %111 = arith.mulf %110, %102 : vector<8x32xf32>
      %112 = vector.broadcast %104 : vector<1x32xf32> to vector<8x32xf32>
      %113 = arith.mulf %112, %101 : vector<8x32xf32>
      %114 = arith.subf %111, %113 : vector<8x32xf32>
      %115 = tpu.concatenate %109, %114 in 1 : vector<8x32xf32>, vector<8x32xf32> -> vector<8x64xf32>
      %c0_29 = arith.constant 0 : index
      %c16 = arith.constant 16 : index
      %116 = vector.load %arg9[%c0_29, %c16] : memref<64x32xf32, #tpu.memory_space<vmem>>, vector<64x8xf32>
      %cst_30 = arith.constant dense<0.000000e+00> : vector<8x8xf32>
      %117 = tpu.matmul %115, %116, %cst_30 {dimension_numbers = #tpu.dot_dimension_numbers<[1], [0], [0], [1], [0, 0, 1, 1], [], []>} : vector<8x64xf32>, vector<64x8xf32>, vector<8x8xf32> -> vector<8x8xf32>
      %118 = vector.extract_strided_slice %52 {offsets = [0, 3], sizes = [8, 1], strides = [1, 1]} : vector<8x4xf32> to vector<8x1xf32>
      %119 = vector.broadcast %118 : vector<8x1xf32> to vector<8x32xf32>
      %120 = vector.broadcast %0 : vector<1x32xf32> to vector<8x32xf32>
      %121 = arith.mulf %119, %120 : vector<8x32xf32>
      %122 = math.cos %121 : vector<8x32xf32>
      %123 = math.sin %121 : vector<8x32xf32>
      %124 = vector.extract_strided_slice %53 {offsets = [3, 0], sizes = [1, 32], strides = [1, 1]} : vector<4x32xf32> to vector<1x32xf32>
      %125 = vector.extract_strided_slice %54 {offsets = [3, 0], sizes = [1, 32], strides = [1, 1]} : vector<4x32xf32> to vector<1x32xf32>
      %126 = vector.broadcast %124 : vector<1x32xf32> to vector<8x32xf32>
      %127 = arith.mulf %126, %122 : vector<8x32xf32>
      %128 = vector.broadcast %125 : vector<1x32xf32> to vector<8x32xf32>
      %129 = arith.mulf %128, %123 : vector<8x32xf32>
      %130 = arith.addf %127, %129 : vector<8x32xf32>
      %131 = vector.broadcast %124 : vector<1x32xf32> to vector<8x32xf32>
      %132 = arith.mulf %131, %123 : vector<8x32xf32>
      %133 = vector.broadcast %125 : vector<1x32xf32> to vector<8x32xf32>
      %134 = arith.mulf %133, %122 : vector<8x32xf32>
      %135 = arith.subf %132, %134 : vector<8x32xf32>
      %136 = tpu.concatenate %130, %135 in 1 : vector<8x32xf32>, vector<8x32xf32> -> vector<8x64xf32>
      %c0_31 = arith.constant 0 : index
      %c24 = arith.constant 24 : index
      %137 = vector.load %arg9[%c0_31, %c24] : memref<64x32xf32, #tpu.memory_space<vmem>>, vector<64x8xf32>
      %cst_32 = arith.constant dense<0.000000e+00> : vector<8x8xf32>
      %138 = tpu.matmul %136, %137, %cst_32 {dimension_numbers = #tpu.dot_dimension_numbers<[1], [0], [0], [1], [0, 0, 1, 1], [], []>} : vector<8x64xf32>, vector<64x8xf32>, vector<8x8xf32> -> vector<8x8xf32>
      %139 = tpu.concatenate %75, %96, %117, %138 in 1 : vector<8x8xf32>, vector<8x8xf32>, vector<8x8xf32>, vector<8x8xf32> -> vector<8x32xf32>
      %c0_33 = arith.constant 0 : index
      %c0_34 = arith.constant 0 : index
      %c0_35 = arith.constant 0 : index
      %140 = vector.load %arg8[%c0_33, %c0_34, %c0_35] : memref<1x8x32xf32, #tpu.memory_space<vmem>>, vector<1x8x32xf32>
      %141 = vector.shape_cast %140 : vector<1x8x32xf32> to vector<8x32xf32>
      %142 = vector.shape_cast %139 : vector<8x32xf32> to vector<1x8x32xf32>
      tpu.vector_store %arg8[%c0_33, %c0_34, %c0_35], %142 {strides = array<i32>} : memref<1x8x32xf32, #tpu.memory_space<vmem>>, vector<1x8x32xf32>,
    } else {
    }
    return
  }
  func.func @transform_0(%arg0: i32, %arg1: i32) -> (i32, i32) {
    %c0_i32 = arith.constant 0 : i32
    %c0_i32_0 = arith.constant 0 : i32
    %c0_i32_1 = arith.constant 0 : i32
    return %c0_i32, %c0_i32_0 : i32, i32
  }
  func.func @transform_1(%arg0: i32, %arg1: i32) -> (i32, i32) {
    %c0_i32 = arith.constant 0 : i32
    %c0_i32_0 = arith.constant 0 : i32
    %c0_i32_1 = arith.constant 0 : i32
    return %c0_i32, %c0_i32_0 : i32, i32
  }
  func.func @transform_2(%arg0: i32, %arg1: i32) -> (i32, i32) {
    %c0_i32 = arith.constant 0 : i32
    %c0_i32_0 = arith.constant 0 : i32
    %c0_i32_1 = arith.constant 0 : i32
    return %c0_i32, %c0_i32_0 : i32, i32
  }
  func.func @transform_3(%arg0: i32, %arg1: i32) -> (i32, i32, i32) {
    %c0_i32 = arith.constant 0 : i32
    %c0_i32_0 = arith.constant 0 : i32
    return %arg0, %arg1, %c0_i32 : i32, i32, i32
  }
  func.func @transform_4(%arg0: i32, %arg1: i32) -> (i32, i32, i32) {
    %c0_i32 = arith.constant 0 : i32
    %c0_i32_0 = arith.constant 0 : i32
    %c0_i32_1 = arith.constant 0 : i32
    return %arg0, %c0_i32, %c0_i32_0 : i32, i32, i32
  }
  func.func @transform_5(%arg0: i32, %arg1: i32) -> (i32, i32, i32) {
    %c0_i32 = arith.constant 0 : i32
    %c0_i32_0 = arith.constant 0 : i32
    return %arg0, %arg1, %c0_i32 : i32, i32, i32
  }
  func.func @transform_6(%arg0: i32, %arg1: i32) -> (i32, i32, i32) {
    %c0_i32 = arith.constant 0 : i32
    %c0_i32_0 = arith.constant 0 : i32
    %c0_i32_1 = arith.constant 0 : i32
    return %arg0, %c0_i32, %c0_i32_0 : i32, i32, i32
  }
}

</mosaic_0001>

<bundles_post_ra>
// kernel: tpu_custom_call.1
= control target key start
LH: loop header
LB: loop body
LE: loop exit
PB: predicated region body
PF: predicated region fallthrough
CT: control target
= control target key end

     0   :  { %11 = vsyncpa [#allocation4], 0  ;;  %s5222_s0 = inlined_call_operand.vmem [shape: f32[1,32], index: 0, kind: input, shape index: {}]   ;;  %s5223_s1 = inlined_call_operand.vmem [shape: f32[4,32], index: 1, kind: input, shape index: {}]   ;;  %s5224_s2 = inlined_call_operand.vmem [shape: f32[4,32], index: 2, kind: input, shape index: {}]   ;;  %s5225_s3 = inlined_call_operand.vmem [shape: f32[2,8,4], index: 3, kind: input, shape index: {}]   ;;  %s5226_s4 = inlined_call_operand.vmem [shape: f32[2,8,4], index: 4, kind: input, shape index: {}]   ;;  %s5227_s5 = inlined_call_operand.vmem [shape: f32[2,8,32], index: 5, kind: input, shape index: {}]   ;;  %s5228_s6 = inlined_call_operand.hbm [shape: f32[2,8,32], index: 6, kind: output, shape index: {}]  }
   0x1   :  { %13 = vsyncpa [#allocation4 + $0x1], 0  ;;  %s4045_s21 = smov 0   ;;  %s4047_s22 = smov 0  }
   0x2   :  { %s4049_s23 = smov 0   ;;  %s4051_s24 = smov 0  }
   0x3   :  { %s4053_s25 = smov 0   ;;  %s4055_s26 = smov 0  }
   0x4 LB: > { %s3446_s27 = sadd.s32 4294967295, %s3988_s26   ;;  %s3447_s28 = sadd.s32 4294967294, %s3988_s26   ;;  %s3988_s26 = sphi %s4055_s26, %s19_s26   ;;  %s3984_s25 = sphi %s4053_s25, %s5247_s25   ;;  %s3980_s24 = sphi %s4051_s24, %s5246_s24   ;;  %s3976_s23 = sphi %s4049_s23, %s5245_s23   ;;  %s3972_s22 = sphi %s4047_s22, %s5244_s22   ;;  %s3968_s21 = sphi %s4045_s21, %s5243_s21  }
   0x5   : > { %s31_s29 = sadd.s32 1, %s3984_s25  ;;  %s183_s30 = sadd.s32 1, %s3976_s23 }
   0x6   : > { %p33_p0 = scmp.ge.s32.totalorder %s31_s29, 2  ;;  %p193_p1 = scmp.ne.s32.totalorder %s3976_s23, %s3972_s22 }
   0x7   : > { %p194_p2 = scmp.eq.s32.totalorder %s3446_s27, 1  ;;  %p199_p3 = scmp.ne.s32.totalorder %s3972_s22, %s3968_s21 }
   0x8   : > { %s5249_s29 = smov (%p33_p0, %s31_s29), 0  ;;  %p200_p5 = scmp.eq.s32.totalorder %s3447_s28, 1 }
   0x9   : > { %p4085_p4 = por %p194_p2, %p193_p1  ;;  %s180_s8 = ssub.s32 %s3984_s25, %s5249_s29 }
   0xa   : > { %p3450_p6 = scmp.ge.s32.totalorder %s3988_s26, 1  ;;  %p181_p7 = scmp.eq.s32.totalorder %s180_s8, 0 }
   0xb   : > { %p4092_p8 = por %p200_p5, %p199_p3  ;;  %p254_p9 = scmp.lt.s32.totalorder %s3988_s26, 3 }
   0xc   : > { %s4098_s10 = scalar_select %p181_p7, %s3976_s23, %s183_s30  }
   0xd   : > { %p255_p10 = pnand %p3450_p6, %p254_p9 }
   0xe   : > { %p297_p11 = scmp.lt.s32.totalorder (!%p255_p10), %s3980_s24, 1  ;;  %s4000_s27 = smov (!%p255_p10), 32  }
   0xf   : > { %258 = sbr.rel (%p255_p10) target bundleno = 1376 (0x560), region = 44  ;;  %s4001_s28 = smov (!%p255_p10), 112  }
  0x10   : > { %s4002_s30 = smov (!%p255_p10), 120   ;;  %s4003_s8 = smov (!%p255_p10), 104  }
  0x11   : > { %s4004_s20 = smov (!%p255_p10), 8   ;;  %s4007_s13 = smov (!%p255_p10), 24  }
  0x14   : > { %v3990_v0 = vmov 2   ;;  %v3991_v1 = vmov 0   ;;  %s298_s11 = scalar_select %p297_p11, %s3980_s24, 1  ;;  %v3992_v3 = vmov 3   ;;  %v3993_v4 = vmov 1  }
  0x15   : > { %3872 = vset.pattern.permute.xlu1 %v3990_v0  ;;  %3870 = vset.pattern.permute.xlu0 %v3991_v1  ;;  %v3455_v6 = vld [vmem:[%s5222_s0] ss:$0 sm:$0xff]  ;;  %v3994_v44 = vmov 920167782   ;;  %v3995_v52 = vmov 2102212464  }
  0x16   : > { %s4104_s12 = sshll.u32 %s298_s11, 3  ;;  %v3996_v57 = vmov 1326507024   ;;  %v3997_v63 = vmov 683565275   ;;  %s4006_s11 = smov 16  }
  0x17   : > { %s303_s15 = scalar_lea.vmem %s5225_s3, %s4104_s12  ;;  %s314_s18 = scalar_lea.vmem %s5227_s5, %s4104_s12 }
  0x18   : > { %v316_v2 = vld [vmem:[%s303_s15] sm:$0xff]  ;;  %s307_s14 = scalar_lea.vmem %s5226_s4, %s4104_s12 }
  0x19   : > { %1088 = vperm.xlu1 %3872, %v316_v2   ;;  %320 = vperm.xlu0 %3870, %v316_v2   ;;  %v4116_v5 = vld [vmem:[%s314_s18] sm:$0xff] }
  0x1a   : > { %3632 = vmatprep.subr.mxu0 %v4116_v5 }
  0x1b   : > { %3633 = vmatpush3.msra.mxu0 %v4116_v5 }
  0x1d   : > { %3873 = vset.pattern.permute.xlu1 %v3992_v3  ;;  %3871 = vset.pattern.permute.xlu0 %v3993_v4 }
  0x1e   : > { %1469 = vperm.xlu1 %3873, %v316_v2   ;;  %706 = vperm.xlu0 %3871, %v316_v2  }
  0x94   : > { %v1089_v7 = vpop.permute.xlu1 %1088  ;;  %v321_v8 = vpop.permute.xlu0 %320 }
  0x95   : > { %v4123_v9 = vmul.f32 %v3455_v6, %v1089_v7  ;;  %v4125_v10 = vmul.f32 %v3455_v6, %v321_v8 }
  0x97   : > { %v1095_v11 = vand.u32 2139095040, %v4123_v9  ;;  %v333_v12 = vand.u32 2139095040, %v4125_v10  ;;  %v330_v22 = vand.u32 2147483647, %v4125_v10  ;;  %v1092_v37 = vand.u32 2147483647, %v4123_v9 }
  0x99   : > { %v1096_v13 = vshrl.u32 %v1095_v11, 23  ;;  %v334_v14 = vshrl.u32 %v333_v12, 23  ;;  %v1470_v15 = vpop.permute.xlu1 %1469  ;;  %v707_v16 = vpop.permute.xlu0 %706  ;;  %v337_v29 = vand.u32 8388607, %v330_v22  ;;  %v4158_v47 = vand.u32 8388607, %v1092_v37 }
  0x9a   : > { %v4129_v17 = vmul.f32 %v3455_v6, %v1470_v15  ;;  %v4131_v18 = vmul.f32 %v3455_v6, %v707_v16  ;;  %v3998_v6 = vmov 2475754826   ;;  %v3999_v11 = vmov 2131351028  }
  0x9b   : > { %v3488_v19 = vadd.s32 4294967169, %v1096_v13  ;;  %v3456_v20 = vadd.s32 4294967169, %v334_v14  ;;  %v338_v40 = vor.u32 8388608, %v337_v29 }
  0x9c   : > { %v713_v21 = vand.u32 2139095040, %v4131_v18  ;;  %v1476_v25 = vand.u32 2139095040, %v4129_v17  ;;  %v710_v33 = vand.u32 2147483647, %v4131_v18 }
  0x9d   : > { %v1102_v23 = vadd.s32 1, %v3488_v19  ;;  %v340_v24 = vadd.s32 1, %v3456_v20  ;;  %v4164_v51 = vshll.u32 %v338_v40, 8 }
  0x9e   : > { %v714_v26 = vshrl.u32 %v713_v21, 23  ;;  %v1477_v32 = vshrl.u32 %v1476_v25, 23  ;;  %v717_v39 = vand.u32 8388607, %v710_v33 }
  0x9f   : > { %vm1103_vm0 = vcmp.gt.s32.totalorder %v1102_v23, 0  ;;  %vm341_vm1 = vcmp.gt.s32.totalorder %v340_v24, 0 }
  0xa0   : > { %v342_v27 = vsel %vm341_vm1, %v340_v24, 0  ;;  %v3472_v28 = vadd.s32 4294967169, %v714_v26  ;;  %v1104_v30 = vsel %vm1103_vm0, %v1102_v23, 0  ;;  %v3504_v38 = vadd.s32 4294967169, %v1477_v32 }
  0xa1   : > { %v4138_v31 = vand.u32 31, %v342_v27  ;;  %v4141_v35 = vand.u32 31, %v1104_v30  ;;  %v4149_v42 = vshrl.u32 %v342_v27, 5  ;;  %v4160_v48 = vshrl.u32 %v1104_v30, 5 }
  0xa2   : > { %v720_v34 = vadd.s32 1, %v3472_v28  ;;  %v4162_v49 = vadd.s32 1, %v3504_v38  ;;  %v718_v50 = vor.u32 8388608, %v717_v39 }
  0xa3   : > { %v4144_v36 = vsub.s32 32, %v4138_v31  ;;  %v4152_v43 = vsub.s32 32, %v4141_v35  ;;  %v4168_v53 = vshll.u32 %v3995_v52, %v4141_v35  ;;  %v4172_v54 = vshll.u32 %v3994_v44, %v4141_v35 }
  0xa4   : > { %vm721_vm2 = vcmp.gt.s32.totalorder %v720_v34, 0  ;;  %v356_v55 = vshll.u32 %v3995_v52, %v4138_v31  ;;  %v359_v56 = vshll.u32 %v3994_v44, %v4138_v31  ;;  %vm365_vm3 = vcmp.lt.s32.totalorder %v4149_v42, 4 }
  0xa5   : > { %v722_v41 = vsel %vm721_vm2, %v720_v34, 0  ;;  %v357_v45 = vshrl.u32 %v3994_v44, %v4144_v36  ;;  %v360_v58 = vshrl.u32 %v3996_v57, %v4144_v36  ;;  %v4183_v61 = vshrl.u32 %v3996_v57, %v4152_v43 }
  0xa6   : > { %v724_v46 = vand.u32 31, %v722_v41  ;;  %v723_v59 = vshrl.u32 %v722_v41, 5  ;;  %vm1484_vm8 = vcmp.gt.s32.totalorder %v4162_v49, 0  ;;  %vm362_vm9 = vcmp.lt.s32.totalorder %v4149_v42, 1 }
  0xa7   : > { %v4185_v62 = vor.u32 %v357_v45, %v356_v55  ;;  %v361_v21 = vor.u32 %v360_v58, %v359_v56  ;;  %v758_v45 = vshll.u32 %v718_v50, 8  ;;  %vm364_vm10 = vcmp.lt.s32.totalorder %v4149_v42, 3 }
  0xa8   : > { %v725_v60 = vsub.s32 32, %v724_v46  ;;  %v727_v2 = vshll.u32 %v3997_v63, %v724_v46  ;;  %v730_v7 = vshll.u32 %v3998_v6, %v724_v46  ;;  %v733_v12 = vshll.u32 %v3999_v11, %v724_v46 }
  0xa9   : > { %v736_v13 = vshll.u32 %v3995_v52, %v724_v46  ;;  %v739_v14 = vshll.u32 %v3994_v44, %v724_v46  ;;  %vm742_vm4 = vcmp.lt.s32.totalorder %v723_v59, 1  ;;  %vm743_vm5 = vcmp.lt.s32.totalorder %v723_v59, 2 }
  0xaa   : > { %v728_v8 = vshrl.u32 %v3998_v6, %v725_v60  ;;  %v731_v15 = vshrl.u32 %v3999_v11, %v725_v60  ;;  %v734_v16 = vshrl.u32 %v3995_v52, %v725_v60  ;;  %v737_v19 = vshrl.u32 %v3994_v44, %v725_v60 }
  0xab   : > { %v740_v20 = vshrl.u32 %v3996_v57, %v725_v60  ;;  %v726_v23 = vshrl.u32 %v3997_v63, %v725_v60  ;;  %vm744_vm6 = vcmp.lt.s32.totalorder %v723_v59, 3  ;;  %vm745_vm7 = vcmp.lt.s32.totalorder %v723_v59, 4 }
  0xac   : > { %v729_v24 = vor.u32 %v728_v8, %v727_v2  ;;  %v732_v25 = vor.u32 %v731_v15, %v730_v7  ;;  %v735_v26 = vor.u32 %v734_v16, %v733_v12  ;;  %v738_v27 = vor.u32 %v737_v19, %v736_v13 }
  0xad   : > { %v741_v28 = vor.u32 %v740_v20, %v739_v14  ;;  %v371_v46 = vsel %vm365_vm3, %v4185_v62, 920167782  ;;  %v375_v55 = vsel %vm365_vm3, %v361_v21, 1326507024  ;;  %v347_v13 = vshll.u32 %v3997_v63, %v4138_v31 }
  0xae   : > { %v746_v29 = vsel %vm742_vm4, %v726_v23, %v729_v24  ;;  %v747_v30 = vsel %vm745_vm7, %v735_v26, 2102212464  ;;  %v750_v32 = vsel %vm742_vm4, %v729_v24, %v732_v25  ;;  %v751_v34 = vsel %vm745_vm7, %v738_v27, 920167782 }
  0xaf   : > { %v754_v38 = vsel %vm742_vm4, %v732_v25, %v735_v26  ;;  %v748_v39 = vsel %vm744_vm6, %v732_v25, %v747_v30  ;;  %v752_v40 = vsel %vm744_vm6, %v735_v26, %v751_v34  ;;  %v755_v41 = vsel %vm745_vm7, %v741_v28, 1326507024 }
  0xb0   : > { %v753_v56 = vsel %vm743_vm5, %v750_v32, %v752_v40  ;;  %v756_v58 = vsel %vm744_vm6, %v738_v27, %v755_v41  ;;  %v749_v60 = vsel %vm743_vm5, %v746_v29, %v748_v39  ;;  %v348_v14 = vshrl.u32 %v3998_v6, %v4144_v36 }
  0xb1   : > { %v757_v2 = vsel %vm743_vm5, %v754_v38, %v756_v58  ;;  %v4207_v7 = vmul.u32.u64.low %v758_v45, %v753_v56  ;;  %v4208_v8 = vmul.u32.u64.high %v758_v45, %v753_v56, %v4207_v7  ;;  %v350_v15 = vshll.u32 %v3998_v6, %v4138_v31 }
  0xb2   : > { %v4211_v12 = vmul.u32.u64.low %v758_v45, %v757_v2  ;;  %v4212_v50 = vmul.u32.u64.high %v758_v45, %v757_v2, %v4211_v12  ;;  %v351_v59 = vshrl.u32 %v3999_v11, %v4144_v36  ;;  %v353_v16 = vshll.u32 %v3999_v11, %v4138_v31 }
  0xb3   : > { %v354_v19 = vshrl.u32 %v3995_v52, %v4144_v36  ;;  %v765_v20 = vmul.u32 %v758_v45, %v749_v60  ;;  %v346_v21 = vshrl.u32 %v3997_v63, %v4144_v36  ;;  %v349_v23 = vor.u32 %v348_v14, %v347_v13 }
  0xb4   : > { %v768_v24 = vadd.s32 1, %v4208_v8  ;;  %v352_v25 = vor.u32 %v351_v59, %v350_v15  ;;  %vm767_vm11 = vc.u32 %v4212_v50, %v4207_v7  ;;  %vm363_vm12 = vcmp.lt.s32.totalorder %v4149_v42, 2 }
  0xb5   : > { %v355_v26 = vor.u32 %v354_v19, %v353_v16  ;;  %v366_v31 = vsel %vm362_vm9, %v346_v21, %v349_v23  ;;  %v376_v27 = vsel %vm364_vm10, %v4185_v62, %v375_v55  ;;  %v1119_v62 = vshrl.u32 %v3994_v44, %v4152_v43 }
  0xb6   : > { %v769_v36 = vsel %vm767_vm11, %v768_v24, %v4208_v8  ;;  %v370_v29 = vsel %vm362_vm9, %v349_v23, %v352_v25  ;;  %v1123_v60 = vor.u32 %v4183_v61, %v4172_v54  ;;  %v1112_v8 = vshll.u32 %v3998_v6, %v4141_v35 }
  0xb7   : > { %v367_v28 = vsel %vm365_vm3, %v355_v26, 2102212464  ;;  %v372_v30 = vsel %vm364_vm10, %v355_v26, %v371_v46  ;;  %v770_v32 = vadd.s32 %v769_v36, %v765_v20  ;;  %v374_v39 = vsel %vm362_vm9, %v352_v25, %v355_v26 }
  0xb8   : > { %v368_v34 = vsel %vm364_vm10, %v352_v25, %v367_v28  ;;  %v373_v38 = vsel %vm363_vm12, %v370_v29, %v372_v30  ;;  %v377_v40 = vsel %vm363_vm12, %v374_v39, %v376_v27  ;;  %v1485_v46 = vsel %vm1484_vm8, %v4162_v49, 0 }
  0xb9   : > { %v4251_v41 = vmul.u32.u64.low %v4164_v51, %v373_v38  ;;  %v4252_v45 = vmul.u32.u64.high %v4164_v51, %v373_v38, %v4251_v41  ;;  %v771_v55 = vadd.s32 536870912, %v770_v32  ;;  %v369_v2 = vsel %vm363_vm12, %v366_v31, %v368_v34 }
  0xba   : > { %v4259_v56 = vmul.u32.u64.low %v4164_v51, %v377_v40  ;;  %v4260_v58 = vmul.u32.u64.high %v4164_v51, %v377_v40, %v4259_v56  ;;  %v1113_v12 = vshrl.u32 %v3999_v11, %v4152_v43  ;;  %vm1127_vm13 = vcmp.lt.s32.totalorder %v4160_v48, 4 }
  0xbb   : > { %v4271_v49 = vshrl.u32 %v771_v55, 30  ;;  %v1115_v13 = vshll.u32 %v3999_v11, %v4141_v35  ;;  %v1116_v14 = vshrl.u32 %v3995_v52, %v4152_v43  ;;  %v1120_v54 = vor.u32 %v1119_v62, %v4168_v53 }
  0xbc   : > { %v388_v42 = vadd.s32 1, %v4252_v45  ;;  %v1109_v61 = vshll.u32 %v3997_v63, %v4141_v35  ;;  %v1110_v15 = vshrl.u32 %v3998_v6, %v4152_v43  ;;  %v4283_v59 = vand.u32 31, %v1485_v46 }
  0xbd   : > { %v773_v16 = vshll.u32 %v4271_v49, 30  ;;  %v385_v19 = vmul.u32 %v4164_v51, %v369_v2  ;;  %vm387_vm14 = vc.u32 %v4260_v58, %v4251_v41  ;;  %v1137_v53 = vsel %vm1127_vm13, %v1123_v60, 1326507024 }
  0xbe   : > { %v389_v20 = vsel %vm387_vm14, %v388_v42, %v4252_v45  ;;  %v1114_v21 = vor.u32 %v1113_v12, %v1112_v8  ;;  %v1117_v23 = vor.u32 %v1116_v14, %v1115_v13  ;;  %vm1124_vm15 = vcmp.lt.s32.totalorder %v4160_v48, 1 }
  0xbf   : > { %v774_v35 = vsub.s32 %v770_v32, %v773_v16  ;;  %v390_v24 = vadd.s32 %v389_v20, %v385_v19  ;;  %vm1126_vm0 = vcmp.lt.s32.totalorder %v4160_v48, 3  ;;  %v1100_v25 = vor.u32 8388608, %v4158_v47 }
  0xc0   : > { %v1111_v26 = vor.u32 %v1110_v15, %v1109_v61  ;;  %v1133_v51 = vsel %vm1127_vm13, %v1120_v54, 920167782  ;;  %vm1125_vm1 = vcmp.lt.s32.totalorder %v4160_v48, 2  ;;  %v1136_v36 = vsel %vm1124_vm15, %v1114_v21, %v1117_v23 }
  0xc1   : > { %v776_v31 = vsub.s32 0, %v774_v35  ;;  %v391_v27 = vadd.s32 536870912, %v390_v24  ;;  %v1138_v28 = vsel %vm1126_vm0, %v1120_v54, %v1137_v53  ;;  %v4303_v29 = vsub.s32 32, %v4283_v59 }
  0xc2   : > { %v1108_v47 = vshrl.u32 %v3997_v63, %v4152_v43  ;;  %v1132_v34 = vsel %vm1124_vm15, %v1111_v26, %v1114_v21  ;;  %v1134_v38 = vsel %vm1126_vm0, %v1117_v23, %v1133_v51  ;;  %v1140_v39 = vshll.u32 %v1100_v25, 8 }
  0xc3   : > { %v3473_v30 = vmin.u32 %v776_v31, %v774_v35  ;;  %v4305_v32 = vshrl.u32 %v391_v27, 30  ;;  %v1129_v45 = vsel %vm1127_vm13, %v1117_v23, 2102212464  ;;  %v1139_v55 = vsel %vm1125_vm1, %v1136_v36, %v1138_v28 }
  0xc4   : > { %v4318_v56 = vshrl.u32 %v1485_v46, 5  ;;  %v1499_v43 = vshll.u32 %v3995_v52, %v4283_v59  ;;  %v1500_v60 = vshrl.u32 %v3994_v44, %v4303_v29  ;;  %vm712_vm2 = vcmp.lt.s32.totalorder %v4131_v18, 0 }
  0xc5   : > { %v778_v62 = vclz %v3473_v30  ;;  %v393_v40 = vshll.u32 %v4305_v32, 30  ;;  %v1135_v12 = vsel %vm1125_vm1, %v1132_v34, %v1134_v38  ;;  %v1128_v13 = vsel %vm1124_vm15, %v1108_v47, %v1111_v26 }
  0xc6   : > { %v1130_v46 = vsel %vm1126_vm0, %v1114_v21, %v1129_v45  ;;  %v4333_v14 = vmul.u32.u64.low %v1140_v39, %v1139_v55  ;;  %v4334_v54 = vmul.u32.u64.high %v1140_v39, %v1139_v55, %v4333_v14  ;;  %v1502_v42 = vshll.u32 %v3994_v44, %v4283_v59 }
  0xc7   : > { %v3474_v2 = vadd.s32 4294967294, %v778_v62  ;;  %v4325_v8 = vsub.s32 %v390_v24, %v393_v40  ;;  %v1503_v61 = vshrl.u32 %v3996_v57, %v4303_v29  ;;  %v766_v16 = vadd.s32 %v4207_v7, %v4212_v50 }
  0xc8   : > { %v4343_v53 = vmul.u32.u64.low %v1140_v39, %v1135_v12  ;;  %v4344_v20 = vmul.u32.u64.high %v1140_v39, %v1135_v12, %v4343_v53  ;;  %v1131_v25 = vsel %vm1125_vm1, %v1128_v13, %v1130_v46  ;;  %v4350_v26 = vor.u32 %v1500_v60, %v1499_v43 }
  0xc9   : > { %vm3475_vm3 = vcmp.lt.s32.totalorder %v3474_v2, 0  ;;  %v396_v15 = vsub.s32 0, %v4325_v8  ;;  %vm1508_vm4 = vcmp.lt.s32.totalorder %v4318_v56, 4  ;;  %v796_v51 = vsub.s32 4, %v4271_v49 }
  0xca   : > { %v781_v19 = vsel %vm3475_vm3, 0, %v3474_v2  ;;  %v1473_v7 = vand.u32 2147483647, %v4129_v17  ;;  %v1504_v28 = vor.u32 %v1503_v61, %v1502_v42  ;;  %vm4357_vm5 = vcmp.le.f32.partialorder %v710_v33, 0.7853982 }
  0xcb   : > { %v782_v21 = vsub.s32 32, %v781_v19  ;;  %v786_v23 = vsub.s32 4294967266, %v781_v19  ;;  %v3457_v24 = vmin.u32 %v396_v15, %v4325_v8  ;;  %v783_v50 = vshll.u32 %v774_v35, %v781_v19 }
  0xcc   : > { %v1147_v48 = vmul.u32 %v1140_v39, %v1131_v25  ;;  %vm1149_vm6 = vc.u32 %v4334_v54, %v4343_v53  ;;  %v1150_v62 = vadd.s32 1, %v4344_v20  ;;  %v1514_v35 = vsel %vm1508_vm4, %v4350_v26, 920167782 }
  0xcd   : > { %v784_v31 = vshrl.u32 %v766_v16, %v782_v21  ;;  %v787_v27 = vadd.s32 127, %v786_v23  ;;  %v398_v36 = vclz %v3457_v24  ;;  %v386_v40 = vadd.s32 %v4251_v41, %v4260_v58 }
  0xce   : > { %v797_v33 = vsel %vm712_vm2, %v796_v51, %v4271_v49  ;;  %v1480_v39 = vand.u32 8388607, %v1473_v7  ;;  %v1151_v55 = vsel %vm1149_vm6, %v1150_v62, %v4344_v20  ;;  %v1490_v43 = vshll.u32 %v3997_v63, %v4283_v59 }
  0xcf   : > { %v785_v47 = vor.u32 %v784_v31, %v783_v50  ;;  %v788_v34 = vshll.u32 %v787_v27, 23  ;;  %v3458_v38 = vadd.s32 4294967294, %v398_v36  ;;  %v1152_v2 = vadd.s32 %v1151_v55, %v1147_v48 }
  0xd0   : > { %v1491_v12 = vshrl.u32 %v3998_v6, %v4303_v29  ;;  %v1493_v41 = vshll.u32 %v3998_v6, %v4283_v59  ;;  %v1494_v42 = vshrl.u32 %v3999_v11, %v4303_v29  ;;  %v1496_v61 = vshll.u32 %v3999_v11, %v4283_v59 }
  0xd1   : > { %v789_v45 = vor.u32 4788187, %v788_v34  ;;  %vm3459_vm7 = vcmp.lt.s32.totalorder %v3458_v38, 0  ;;  %v792_v49 = vcvt.s32.f32 %v785_v47  ;;  %v1153_v14 = vadd.s32 536870912, %v1152_v2 }
  0xd2   : > { %v401_v60 = vsel %vm3459_vm7, 0, %v3458_v38  ;;  %v1497_v15 = vshrl.u32 %v3995_v52, %v4303_v29  ;;  %v1518_v23 = vsel %vm1508_vm4, %v1504_v28, 1326507024  ;;  %v416_v24 = vsub.s32 4, %v4305_v32 }
  0xd3   : > { %v790_v58 = vand.u32 2147483647, %v789_v45  ;;  %v402_v13 = vsub.s32 32, %v401_v60  ;;  %v406_v46 = vsub.s32 4294967266, %v401_v60  ;;  %v403_v19 = vshll.u32 %v4325_v8, %v401_v60 }
  0xd4   : > { %v799_v25 = vsel %vm4357_vm5, 0, %v797_v33  ;;  %v4393_v51 = vshrl.u32 %v1153_v14, 30  ;;  %v1481_v27 = vor.u32 8388608, %v1480_v39  ;;  %v1492_v48 = vor.u32 %v1491_v12, %v1490_v43 }
  0xd5   : > { %v793_v16 = vmul.f32 %v792_v49, %v790_v58  ;;  %v404_v20 = vshrl.u32 %v386_v40, %v402_v13  ;;  %v407_v21 = vadd.s32 127, %v406_v46  ;;  %v1495_v8 = vor.u32 %v1494_v42, %v1493_v41 }
  0xd6   : > { %v1155_v36 = vshll.u32 %v4393_v51, 30  ;;  %v1498_v47 = vor.u32 %v1497_v15, %v1496_v61  ;;  %vm1505_vm8 = vcmp.lt.s32.totalorder %v4318_v56, 1  ;;  %vm1507_vm9 = vcmp.lt.s32.totalorder %v4318_v56, 3 }
  0xd7   : > { %v794_v50 = vxor.u32 2147483648, %v793_v16  ;;  %v405_v59 = vor.u32 %v404_v20, %v403_v19  ;;  %v408_v31 = vshll.u32 %v407_v21, 23  ;;  %v1489_v40 = vshrl.u32 %v3997_v63, %v4303_v29 }
  0xd8   : > { %v4403_v62 = vsub.s32 %v1152_v2, %v1155_v36  ;;  %vm1506_vm10 = vcmp.lt.s32.totalorder %v4318_v56, 2  ;;  %v1510_v45 = vsel %vm1508_vm4, %v1498_v47, 2102212464  ;;  %v1513_v30 = vsel %vm1505_vm8, %v1492_v48, %v1495_v8 }
  0xd9   : > { %v795_v34 = vsel %vm712_vm2, %v794_v50, %v793_v16  ;;  %v409_v28 = vor.u32 4788187, %v408_v31  ;;  %v412_v39 = vcvt.s32.f32 %v405_v59  ;;  %v1515_v43 = vsel %vm1507_vm9, %v1498_v47, %v1514_v35 }
  0xda   : > { %v798_v38 = vsel %vm4357_vm5, %v4131_v18, %v795_v34  ;;  %v1158_v55 = vsub.s32 0, %v4403_v62  ;;  %v1517_v29 = vsel %vm1505_vm8, %v1495_v8, %v1498_v47  ;;  %v1519_v2 = vsel %vm1507_vm9, %v4350_v26, %v1518_v23 }
  0xdb   : > { %v410_v33 = vand.u32 2147483647, %v409_v28  ;;  %3879 = vcosq.f32 %v798_v38  ;;  %v1521_v12 = vshll.u32 %v1481_v27, 8  ;;  %v1509_v58 = vsel %vm1505_vm8, %v1489_v40, %v1492_v48 }
  0xdc   : > { %3881 = vsinq.f32 %v798_v38  ;;  %v3489_v41 = vmin.u32 %v1158_v55, %v4403_v62  ;;  %v1511_v49 = vsel %vm1507_vm9, %v1495_v8, %v1510_v45  ;;  %vm332_vm11 = vcmp.lt.s32.totalorder %v4125_v10, 0 }
  0xdd   : > { %v413_v60 = vmul.f32 %v412_v39, %v410_v33  ;;  %v1516_v13 = vsel %vm1506_vm10, %v1513_v30, %v1515_v43  ;;  %v1520_v46 = vsel %vm1506_vm10, %v1517_v29, %v1519_v2  ;;  %v906_v14 = vadd.s32 3, %v799_v25 }
  0xde   : > { %v1160_v26 = vclz %v3489_v41  ;;  %v4430_v42 = vmul.u32.u64.low %v1521_v12, %v1520_v46  ;;  %v4431_v61 = vmul.u32.u64.high %v1521_v12, %v1520_v46, %v4430_v42  ;;  %vm331_vm12 = vcmp.le.f32.partialorder %v330_v22, 0.7853982 }
  0xdf   : > { %v414_v35 = vxor.u32 2147483648, %v413_v60  ;;  %v417_v16 = vsel %vm332_vm11, %v416_v24, %v4305_v32  ;;  %v1512_v19 = vsel %vm1506_vm10, %v1509_v58, %v1511_v49  ;;  %v803_v59 = vand.u32 3, %v799_v25 }
  0xe0   : > { %v3490_v21 = vadd.s32 4294967294, %v1160_v26  ;;  %v4439_v23 = vmul.u32.u64.low %v1521_v12, %v1516_v13  ;;  %v4440_v50 = vmul.u32.u64.high %v1521_v12, %v1516_v13, %v4439_v23  ;;  %v907_v31 = vand.u32 3, %v906_v14 }
  0xe1   : > { %v415_v15 = vsel %vm332_vm11, %v414_v35, %v413_v60  ;;  %v419_v27 = vsel %vm331_vm12, 0, %v417_v16  ;;  %v1528_v36 = vmul.u32 %v1521_v12, %v1512_v19  ;;  %v1148_v32 = vadd.s32 %v4343_v53, %v4334_v54 }
  0xe2   : > { %v418_v20 = vsel %vm331_vm12, %v4125_v10, %v415_v15  ;;  %vm3491_vm13 = vcmp.lt.s32.totalorder %v3490_v21, 0  ;;  %vm1530_vm14 = vc.u32 %v4431_v61, %v4439_v23  ;;  %v1531_v48 = vadd.s32 1, %v4440_v50 }
  0xe3   : > { %3883 = vcosq.f32 %v418_v20  ;;  %v1163_v22 = vsel %vm3491_vm13, 0, %v3490_v21  ;;  %vm802_vm15 = vweird.f32 %v4131_v18  ;;  %vm804_vm0 = vcmp.lt.s32.totalorder %v803_v59, 2 }
  0xe4   : > { %3885 = vsinq.f32 %v418_v20  ;;  %v1164_v56 = vsub.s32 32, %v1163_v22  ;;  %v1168_v24 = vsub.s32 4294967266, %v1163_v22  ;;  %vm805_vm1 = vcmp.eq.s32.totalorder %v803_v59, 0 }
  0xe5   : > { %vm808_vm2 = vcmp.eq.s32.totalorder %v803_v59, 2  ;;  %v1165_v8 = vshll.u32 %v4403_v62, %v1163_v22  ;;  %v1532_v28 = vsel %vm1530_vm14, %v1531_v48, %v4440_v50  ;;  %v526_v40 = vadd.s32 3, %v419_v27 }
  0xe6   : > { %v1166_v47 = vshrl.u32 %v1148_v32, %v1164_v56  ;;  %v1169_v34 = vadd.s32 127, %v1168_v24  ;;  %vm908_vm3 = vcmp.lt.s32.totalorder %v907_v31, 2  ;;  %v1533_v54 = vadd.s32 %v1532_v28, %v1528_v36 }
  0xe7   : > { %vm912_vm4 = vcmp.eq.s32.totalorder %v907_v31, 2  ;;  %vm909_vm5 = vcmp.eq.s32.totalorder %v907_v31, 0  ;;  %v423_v60 = vand.u32 3, %v419_v27  ;;  %v527_v12 = vand.u32 3, %v526_v40 }
  0xe8   : > { %v3880_v25 = vpop.eup %3879  ;;  %v1167_v39 = vor.u32 %v1166_v47, %v1165_v8  ;;  %v1170_v45 = vshll.u32 %v1169_v34, 23  ;;  %v1534_v43 = vadd.s32 536870912, %v1533_v54  ;;  %vm422_vm6 = vweird.f32 %v4125_v10 }
  0xe9   : > { %v3882_v38 = vpop.eup %3881  ;;  %v809_v33 = vxor.u32 2147483648, %v3880_v25  ;;  %vm424_vm7 = vcmp.lt.s32.totalorder %v423_v60, 2  ;;  %vm4467_vm8 = vcmp.le.f32.partialorder %v1092_v37, 0.7853982  ;;  %vm1094_vm9 = vcmp.lt.s32.totalorder %v4123_v9, 0 }
  0xea   : > { %v806_v53 = vxor.u32 2147483648, %v3882_v38  ;;  %v1171_v2 = vor.u32 4788187, %v1170_v45  ;;  %v4454_v49 = vshrl.u32 %v1534_v43, 30  ;;  %v1174_v14 = vcvt.s32.f32 %v1167_v39 }
  0xeb   : > { %v914_v55 = vsel %vm912_vm4, %v809_v33, %v3882_v38  ;;  %v810_v30 = vsel %vm808_vm2, %v809_v33, %v3882_v38  ;;  %vm425_vm10 = vcmp.eq.s32.totalorder %v423_v60, 0  ;;  %vm428_vm11 = vcmp.eq.s32.totalorder %v423_v60, 2 }
  0xec   : > { %v911_v62 = vsel %vm909_vm5, %v3880_v25, %v806_v53  ;;  %v807_v29 = vsel %vm805_vm1, %v3880_v25, %v806_v53  ;;  %v1172_v46 = vand.u32 2147483647, %v1171_v2  ;;  %v1536_v26 = vshll.u32 %v4454_v49, 30 }
  0xed   : > { %v915_v41 = vsel %vm908_vm3, %v911_v62, %v914_v55  ;;  %v811_v58 = vsel %vm804_vm0, %v807_v29, %v810_v30  ;;  %vm529_vm12 = vcmp.eq.s32.totalorder %v527_v12, 0  ;;  %vm532_vm13 = vcmp.eq.s32.totalorder %v527_v12, 2 }
  0xee   : > { %v916_v35 = vsel %vm802_vm15, nan, %v915_v41  ;;  %v4460_v13 = vsel %vm802_vm15, nan, %v811_v58  ;;  %v1175_v18 = vmul.f32 %v1174_v14, %v1172_v46  ;;  %v1537_v20 = vsub.s32 %v1533_v54, %v1536_v26 }
  0xef   : > { %918 = vrot.lane.b32.xlu0 %v916_v35, %s4000_s27  ;;  %v1178_v37 = vsub.s32 4, %v4393_v51  ;;  %vm528_vm14 = vcmp.lt.s32.totalorder %v527_v12, 2  ;;  %v1529_v54 = vadd.s32 %v4439_v23, %v4431_v61 }
  0xf0   : > { %v3884_v42 = vpop.eup %3883  ;;  %v1176_v50 = vxor.u32 2147483648, %v1175_v18  ;;  %v1539_v27 = vsub.s32 0, %v1537_v20 }
  0xf1   : > { %v3886_v16 = vpop.eup %3885  ;;  %v429_v19 = vxor.u32 2147483648, %v3884_v42  ;;  %v1179_v34 = vsel %vm1094_vm9, %v1178_v37, %v4393_v51 }
  0xf2   : > { %v426_v21 = vxor.u32 2147483648, %v3886_v16  ;;  %v1177_v32 = vsel %vm1094_vm9, %v1176_v50, %v1175_v18  ;;  %v3505_v25 = vmin.u32 %v1539_v27, %v1537_v20  ;;  %v1181_v40 = vsel %vm4467_vm8, 0, %v1179_v34 }
  0xf3   : > { %v534_v59 = vsel %vm532_vm13, %v429_v19, %v3886_v16  ;;  %v430_v31 = vsel %vm428_vm11, %v429_v19, %v3886_v16  ;;  %1336 = vrot.lane.b32.xlu0 %v4116_v5, %s4001_s28  ;;  %v1180_v48 = vsel %vm4467_vm8, %v4123_v9, %v1177_v32  ;;  %v1288_v33 = vadd.s32 3, %v1181_v40 }
  0xf4   : > { %v531_v22 = vsel %vm529_vm12, %v3884_v42, %v426_v21  ;;  %v427_v36 = vsel %vm425_vm10, %v3884_v42, %v426_v21  ;;  %3887 = vcosq.f32 %v1180_v48  ;;  %v1541_v28 = vclz %v3505_v25 }
  0xf5   : > { %v535_v56 = vsel %vm528_vm14, %v531_v22, %v534_v59  ;;  %v431_v24 = vsel %vm424_vm7, %v427_v36, %v430_v31  ;;  %3889 = vsinq.f32 %v1180_v48  ;;  %v1185_v30 = vand.u32 3, %v1181_v40 }
  0xf6   : > { %v536_v8 = vsel %vm422_vm6, nan, %v535_v56  ;;  %v4486_v47 = vsel %vm422_vm6, nan, %v431_v24  ;;  %v3506_v38 = vadd.s32 4294967294, %v1541_v28  ;;  %v1289_v43 = vand.u32 3, %v1288_v33 }
  0xf7   : > { %538 = vrot.lane.b32.xlu1 %v536_v8, %s4000_s27  ;;  %vm1186_vm0 = vcmp.lt.s32.totalorder %v1185_v30, 2  ;;  %vm1190_vm1 = vcmp.eq.s32.totalorder %v1185_v30, 2  ;;  %vm1187_vm3 = vcmp.eq.s32.totalorder %v1185_v30, 0  ;;  %vm1184_vm6 = vweird.f32 %v4123_v9 }
  0xf8   : > { %vm3507_vm15 = vcmp.lt.s32.totalorder %v3506_v38, 0  ;;  %vm1294_vm2 = vcmp.eq.s32.totalorder %v1289_v43, 2  ;;  %vm1291_vm4 = vcmp.eq.s32.totalorder %v1289_v43, 0  ;;  %vm1290_vm5 = vcmp.lt.s32.totalorder %v1289_v43, 2 }
  0xf9   : > { %v1544_v10 = vsel %vm3507_vm15, 0, %v3506_v38  ;;  %vm1475_vm7 = vcmp.lt.s32.totalorder %v4129_v17, 0  ;;  %vm1474_vm8 = vcmp.le.f32.partialorder %v1473_v7, 0.7853982  ;;  %vm1565_vm15 = vweird.f32 %v4129_v17 }
  0xfa   : > { %v1545_v53 = vsub.s32 32, %v1544_v10  ;;  %v1549_v39 = vsub.s32 4294967266, %v1544_v10  ;;  %v1546_v51 = vshll.u32 %v1537_v20, %v1544_v10  ;;  %v1559_v20 = vsub.s32 4, %v4454_v49 }
  0xfb   : > { %955 = vrot.lane.b32.xlu1 %v4116_v5, %s4002_s30 }
  0xfc   : > { %v1547_v45 = vshrl.u32 %v1529_v54, %v1545_v53  ;;  %v1550_v55 = vadd.s32 127, %v1549_v39  ;;  %v1560_v9 = vsel %vm1475_vm7, %v1559_v20, %v4454_v49 }
  0xfd   : > { %v1562_v59 = vsel %vm1474_vm8, 0, %v1560_v9 }
  0xfe   : > { %v1548_v60 = vor.u32 %v1547_v45, %v1546_v51  ;;  %v1551_v62 = vshll.u32 %v1550_v55, 23  ;;  %v1669_v31 = vadd.s32 3, %v1562_v59  ;;  %v1566_v37 = vand.u32 3, %v1562_v59 }
  0xff   : > { %1717 = vrot.lane.b32.xlu1 %v4116_v5, %s4003_s8 }
 0x100   : > { %v1552_v2 = vor.u32 4788187, %v1551_v62  ;;  %v1555_v58 = vcvt.s32.f32 %v1548_v60  ;;  %v1670_v27 = vand.u32 3, %v1669_v31  ;;  %vm1571_vm9 = vcmp.eq.s32.totalorder %v1566_v37, 2 }
 0x101   : > { %v3888_v29 = vpop.eup %3887  ;;  %vm1568_vm11 = vcmp.eq.s32.totalorder %v1566_v37, 0  ;;  %vm1567_vm13 = vcmp.lt.s32.totalorder %v1566_v37, 2 }
 0x102   : > { %v3890_v12 = vpop.eup %3889  ;;  %v1191_v41 = vxor.u32 2147483648, %v3888_v29  ;;  %v1553_v23 = vand.u32 2147483647, %v1552_v2  ;;  %vm1675_vm10 = vcmp.eq.s32.totalorder %v1670_v27, 2  ;;  %vm1672_vm12 = vcmp.eq.s32.totalorder %v1670_v27, 0 }
 0x103   : > { %v1188_v61 = vxor.u32 2147483648, %v3890_v12  ;;  %vm1671_vm14 = vcmp.lt.s32.totalorder %v1670_v27, 2  ;;  %v4561_v27 = vld [vmem:[%s5222_s0] ss:$0 sm:$0xff] }
 0x104   : > { %v1192_v35 = vsel %vm1190_vm1, %v1191_v41, %v3890_v12  ;;  %v1296_v5 = vsel %vm1294_vm2, %v1191_v41, %v3890_v12  ;;  %v1556_v26 = vmul.f32 %v1555_v58, %v1553_v23  ;;  %vm575_vm1 = vcmask 64512  }
 0x105   : > { %v1189_v46 = vsel %vm1187_vm3, %v3888_v29, %v1188_v61  ;;  %v1293_v14 = vsel %vm1291_vm4, %v3888_v29, %v1188_v61 }
 0x106   : > { %v1193_v42 = vsel %vm1186_vm0, %v1189_v46, %v1192_v35  ;;  %v1297_v15 = vsel %vm1290_vm5, %v1293_v14, %v1296_v5  ;;  %v1557_v19 = vxor.u32 2147483648, %v1556_v26  ;;  %vm541_vm0 = vcmask 261120  }
 0x107   : > { %v1194_v18 = vsel %vm1184_vm6, nan, %v1193_v42  ;;  %v1298_v16 = vsel %vm1184_vm6, nan, %v1297_v15 }
 0x108   : > { %1300 = vrot.lane.b32.xlu1 %v1298_v16, %s4000_s27  ;;  %v1558_v21 = vsel %vm1475_vm7, %v1557_v19, %v1556_v26 }
 0x109   : > { %v1561_v50 = vsel %vm1474_vm8, %v4129_v17, %v1558_v21 }
 0x10a   : > { %3891 = vcosq.f32 %v1561_v50 }
 0x10b   : > { %3893 = vsinq.f32 %v1561_v50 }
 0x117   : > { %v3892_v22 = vpop.eup %3891 }
 0x118   : > { %v3894_v36 = vpop.eup %3893  ;;  %v1572_v32 = vxor.u32 2147483648, %v3892_v22 }
 0x119   : > { %v1569_v56 = vxor.u32 2147483648, %v3894_v36 }
 0x11a   : > { %v1573_v24 = vsel %vm1571_vm9, %v1572_v32, %v3894_v36  ;;  %v1677_v7 = vsel %vm1675_vm10, %v1572_v32, %v3894_v36 }
 0x11b   : > { %v1570_v48 = vsel %vm1568_vm11, %v3892_v22, %v1569_v56  ;;  %v1674_v25 = vsel %vm1672_vm12, %v3892_v22, %v1569_v56 }
 0x11c   : > { %v1574_v49 = vsel %vm1567_vm13, %v1570_v48, %v1573_v24  ;;  %v1678_v8 = vsel %vm1671_vm14, %v1674_v25, %v1677_v7 }
 0x11d   : > { %v1575_v34 = vsel %vm1565_vm15, nan, %v1574_v49  ;;  %v1679_v28 = vsel %vm1565_vm15, nan, %v1678_v8 }
 0x11e   : > { %1681 = vrot.lane.b32.xlu0 %v1679_v28, %s4000_s27 }
 0x161   : > { %v919_v38 = vpop.permute.xlu0 %918 }
 0x162   : > { %v921_v40 = vsel %vm541_vm0, %v4460_v13, %v919_v38 }
 0x163   : > { %922 = vxpose.xlu1.b32.start.end [1/1] (short) (narrow) %v921_v40, 64 }
 0x165   : > { %v1337_v10 = vpop.permute.xlu0 %1336 }
 0x166   : > { %3660 = vmatprep.subr.mxu0 %v1337_v10 }
 0x169   : > { %v539_v33 = vpop.permute.xlu1 %538 }
 0x16a   : > { %v542_v54 = vsel %vm541_vm0, %v4486_v47, %v539_v33  ;;  %v2010_v47 = vld [vmem:[%s307_s14] sm:$0xff] }
 0x16b   : > { %543 = vxpose.xlu0.b32.start.end [1/1] (short) (narrow) %v542_v54, 64 }
 0x16d   : > { %v956_v17 = vpop.permute.xlu1 %955 }
 0x16e   : > { %3646 = vmatprep.subr.mxu1 %v956_v17 }
 0x16f   : > { %3647 = vmatpush3.msra.mxu1 %v956_v17 }
 0x171   : > { %v1718_v53 = vpop.permute.xlu1 %1717 }
 0x172   : > { %3674 = vmatprep.subr.mxu1 %v1718_v53 }
 0x17a   : > { %v1301_v39 = vpop.permute.xlu1 %1300 }
 0x17b   : > { %v1303_v51 = vsel %vm541_vm0, %v1194_v18, %v1301_v39 }
 0x188   : > { %1304 = vxpose.xlu0.b32.start.end [1/1] (short) (narrow) %v1303_v51, 64 }
 0x190   : > { %v1682_v45 = vpop.permute.xlu0 %1681 }
 0x191   : > { %v1684_v13 = vsel %vm541_vm0, %v1575_v34, %v1682_v45 }
 0x192   : > { %1685 = vxpose.xlu1.b32.start.end [1/1] (short) (narrow) %v1684_v13, 64 }
 0x1b0   : > { %3875 = vset.pattern.permute.xlu1 %v3993_v4 }
 0x1b1   : > { %3874 = vset.pattern.permute.xlu0 %v3991_v1 }
 0x1cc   : > { %2328 = vperm.xlu1 %3875, %v2010_v47  }
 0x1cd   : > { %2015 = vperm.xlu0 %3874, %v2010_v47  }
 0x1d0   : > { %3877 = vset.pattern.permute.xlu1 %v3992_v3 }
 0x1d1   : > { %3876 = vset.pattern.permute.xlu0 %v3990_v0  ;;  %2992 = vperm.xlu1 %3877, %v2010_v47  }
 0x1d2   : > { %2664 = vperm.xlu0 %3876, %v2010_v47  }
 0x1d6   : > { %3878 = vset.pattern.permute.xlu0 %v3992_v3 }
 0x1df   : > { %v938_v55 = vpop.trf.xlu1 }
 0x1e0   : > { %3648 = vmatprep.mubr.msk.f32.mxu1 %vm575_vm1, %v938_v55 }
 0x1e3   : > { %v939_v1 = vpop.trf.xlu1 }
 0x1e4   : > { %3649 = vmatmul.mubr.msk.f32.vlgmr.msra.gmra.mxu1 %vm575_vm1, %v939_v1 }
 0x1e5   : > { %3675 = vmatpush3.msra.mxu1 %v1718_v53 }
 0x1e7   : > { %v559_v4 = vpop.trf.xlu0  ;;  %v940_v30 = vpop.trf.xlu1 }
 0x1e8   : > { %3634 = vmatprep.mubr.msk.f32.mxu0 %vm575_vm1, %v559_v4  ;;  %3651 = vmatprep.mubr.msk.f32.mxu1 %vm575_vm1, %v940_v30 }
 0x1eb   : > { %v560_v0 = vpop.trf.xlu0  ;;  %v941_v43 = vpop.trf.xlu1 }
 0x1ec   : > { %3635 = vmatmul.mubr.msk.f32.vlgmr.msra.gmra.mxu0 %vm575_vm1, %v560_v0  ;;  %3652 = vmatmul.mubr.msk.f32.gmra.mxu1 %vm575_vm1, %v941_v43 }
 0x1ed   : > { %3661 = vmatpush3.msra.mxu0 %v1337_v10 }
 0x1ef   : > { %v561_v3 = vpop.trf.xlu0  ;;  %v942_v60 = vpop.trf.xlu1 }
 0x1f0   : > { %3637 = vmatprep.mubr.msk.f32.mxu0 %vm575_vm1, %v561_v3  ;;  %3654 = vmatprep.mubr.msk.f32.mxu1 %vm575_vm1, %v942_v60 }
 0x1f3   : > { %v562_v62 = vpop.trf.xlu0  ;;  %v943_v29 = vpop.trf.xlu1 }
 0x1f4   : > { %3638 = vmatmul.mubr.msk.f32.gmra.mxu0 %vm575_vm1, %v562_v62  ;;  %3655 = vmatmul.mubr.msk.f32.gmra.mxu1 %vm575_vm1, %v943_v29 }
 0x1f7   : > { %v563_v2 = vpop.trf.xlu0  ;;  %v944_v12 = vpop.trf.xlu1 }
 0x1f8   : > { %3640 = vmatprep.mubr.msk.f32.mxu0 %vm575_vm1, %v563_v2  ;;  %3657 = vmatprep.mubr.msk.f32.mxu1 %vm575_vm1, %v944_v12 }
 0x1fb   : > { %v564_v41 = vpop.trf.xlu0  ;;  %v945_v61 = vpop.trf.xlu1 }
 0x1fc   : > { %3641 = vmatmul.mubr.msk.f32.gmra.mxu0 %vm575_vm1, %v564_v41  ;;  %3658 = vmatmul.mubr.msk.f32.gmra.mxu1 %vm575_vm1, %v945_v61 }
 0x1ff   : > { %v565_v23 = vpop.trf.xlu0 }
 0x200   : > { %3643 = vmatprep.mubr.msk.f32.mxu0 %vm575_vm1, %v565_v23 }
 0x203   : > { %v566_v58 = vpop.trf.xlu0 }
 0x204   : > { %3644 = vmatmul.mubr.msk.f32.gmra.mxu0 %vm575_vm1, %v566_v58 }
 0x207   : > { %v1320_v35 = vpop.trf.xlu0 }
 0x208   : > { %3662 = vmatprep.mubr.msk.f32.mxu0 %vm575_vm1, %v1320_v35 }
 0x20b   : > { %v1321_v5 = vpop.trf.xlu0 }
 0x20c   : > { %3663 = vmatmul.mubr.msk.f32.vlgmr.msra.gmra.mxu0 %vm575_vm1, %v1321_v5 }
 0x20e   : > { %v1701_v14 = vpop.trf.xlu1 }
 0x20f   : > { %v1322_v46 = vpop.trf.xlu0  ;;  %3676 = vmatprep.mubr.msk.f32.mxu1 %vm575_vm1, %v1701_v14 }
 0x210   : > { %3665 = vmatprep.mubr.msk.f32.mxu0 %vm575_vm1, %v1322_v46 }
 0x212   : > { %v1702_v42 = vpop.trf.xlu1 }
 0x213   : > { %v1323_v26 = vpop.trf.xlu0  ;;  %3677 = vmatmul.mubr.msk.f32.vlgmr.msra.gmra.mxu1 %vm575_vm1, %v1702_v42 }
 0x214   : > { %3666 = vmatmul.mubr.msk.f32.gmra.mxu0 %vm575_vm1, %v1323_v26 }
 0x216   : > { %v1703_v18 = vpop.trf.xlu1 }
 0x217   : > { %v1324_v15 = vpop.trf.xlu0  ;;  %3679 = vmatprep.mubr.msk.f32.mxu1 %vm575_vm1, %v1703_v18 }
 0x218   : > { %3668 = vmatprep.mubr.msk.f32.mxu0 %vm575_vm1, %v1324_v15 }
 0x21a   : > { %v1704_v19 = vpop.trf.xlu1 }
 0x21b   : > { %v1325_v16 = vpop.trf.xlu0  ;;  %3680 = vmatmul.mubr.msk.f32.gmra.mxu1 %vm575_vm1, %v1704_v19 }
 0x21c   : > { %3669 = vmatmul.mubr.msk.f32.gmra.mxu0 %vm575_vm1, %v1325_v16 }
 0x21e   : > { %v1705_v21 = vpop.trf.xlu1 }
 0x21f   : > { %v1326_v20 = vpop.trf.xlu0  ;;  %3682 = vmatprep.mubr.msk.f32.mxu1 %vm575_vm1, %v1705_v21 }
 0x220   : > { %3671 = vmatprep.mubr.msk.f32.mxu0 %vm575_vm1, %v1326_v20 }
 0x222   : > { %v1706_v9 = vpop.trf.xlu1 }
 0x223   : > { %v1327_v50 = vpop.trf.xlu0  ;;  %3683 = vmatmul.mubr.msk.f32.gmra.mxu1 %vm575_vm1, %v1706_v9 }
 0x224   : > { %3672 = vmatmul.mubr.msk.f32.gmra.mxu0 %vm575_vm1, %v1327_v50 }
 0x226   : > { %v1707_v59 = vpop.trf.xlu1 }
 0x227   : > { %3685 = vmatprep.mubr.msk.f32.mxu1 %vm575_vm1, %v1707_v59 }
 0x22a   : > { %v1708_v31 = vpop.trf.xlu1 }
 0x22b   : > { %3686 = vmatmul.mubr.msk.f32.gmra.mxu1 %vm575_vm1, %v1708_v31 }
 0x247   : > { %v2329_v36 = vpop.permute.xlu1 %2328 }
 0x248   : > { %v2016_v37 = vpop.permute.xlu0 %2015  ;;  %v4569_v24 = vmul.f32 %v4561_v27, %v2329_v36 }
 0x249   : > { %v4564_v22 = vmul.f32 %v4561_v27, %v2016_v37 }
 0x24a   : > { %v2332_v25 = vand.u32 2147483647, %v4569_v24  ;;  %v2335_v49 = vand.u32 2139095040, %v4569_v24 }
 0x24b   : > { %v2019_v32 = vand.u32 2147483647, %v4564_v22  ;;  %v2022_v56 = vand.u32 2139095040, %v4564_v22  ;;  %vm2021_vm14 = vcmp.lt.s32.totalorder %v4564_v22, 0 }
 0x24c   : > { %v2336_v34 = vshrl.u32 %v2335_v49, 23  ;;  %v4577_v10 = vand.u32 8388607, %v2332_v25 }
 0x24d   : > { %v2023_v7 = vshrl.u32 %v2022_v56, 23  ;;  %v2026_v48 = vand.u32 8388607, %v2019_v32 }
 0x24e   : > { %v3529_v40 = vadd.s32 4294967169, %v2336_v34  ;;  %v2340_v51 = vor.u32 8388608, %v4577_v10 }
 0x24f   : > { %v3520_v8 = vadd.s32 4294967169, %v2023_v7  ;;  %v2027_v38 = vor.u32 8388608, %v2026_v48 }
 0x250   : > { %v2342_v54 = vadd.s32 1, %v3529_v40 }
 0x251   : > { %v2029_v28 = vadd.s32 1, %v3520_v8  ;;  %v4579_v39 = vshll.u32 %v2027_v38, 8 }
 0x252   : > { %vm2343_vm3 = vcmp.gt.s32.totalorder %v2342_v54, 0 }
 0x253   : > { %vm2030_vm2 = vcmp.gt.s32.totalorder %v2029_v28, 0  ;;  %v2344_v41 = vsel %vm2343_vm3, %v2342_v54, 0  ;;  %vm4682_vm3 = vcmp.le.f32.partialorder %v2019_v32, 0.7853982 }
 0x254   : > { %v2031_v33 = vsel %vm2030_vm2, %v2029_v28, 0  ;;  %v2345_v58 = vshrl.u32 %v2344_v41, 5  ;;  %v2346_v35 = vand.u32 31, %v2344_v41 }
 0x255   : > { %v2032_v17 = vshrl.u32 %v2031_v33, 5  ;;  %v2033_v53 = vand.u32 31, %v2031_v33 }
 0x256   : > { %v2347_v16 = vsub.s32 32, %v2346_v35  ;;  %v2349_v50 = vshll.u32 %v3997_v63, %v2346_v35  ;;  %v2352_v8 = vshll.u32 %v3998_v6, %v2346_v35  ;;  %v2355_v28 = vshll.u32 %v3999_v11, %v2346_v35 }
 0x257   : > { %v2034_v45 = vsub.s32 32, %v2033_v53  ;;  %v2036_v13 = vshll.u32 %v3997_v63, %v2033_v53  ;;  %v2039_v47 = vshll.u32 %v3998_v6, %v2033_v53  ;;  %v2042_v55 = vshll.u32 %v3999_v11, %v2033_v53 }
 0x258   : > { %v2045_v1 = vshll.u32 %v3995_v52, %v2033_v53  ;;  %v2048_v4 = vshll.u32 %v3994_v44, %v2033_v53  ;;  %vm2051_vm4 = vcmp.lt.s32.totalorder %v2032_v17, 1  ;;  %vm2052_vm5 = vcmp.lt.s32.totalorder %v2032_v17, 2 }
 0x259   : > { %v2035_v30 = vshrl.u32 %v3997_v63, %v2034_v45  ;;  %v2037_v0 = vshrl.u32 %v3998_v6, %v2034_v45  ;;  %v2040_v43 = vshrl.u32 %v3999_v11, %v2034_v45  ;;  %v2043_v3 = vshrl.u32 %v3995_v52, %v2034_v45 }
 0x25a   : > { %v2046_v60 = vshrl.u32 %v3994_v44, %v2034_v45  ;;  %v2049_v62 = vshrl.u32 %v3996_v57, %v2034_v45  ;;  %vm2053_vm6 = vcmp.lt.s32.totalorder %v2032_v17, 3  ;;  %vm2054_vm7 = vcmp.lt.s32.totalorder %v2032_v17, 4 }
 0x25b   : > { %v2038_v29 = vor.u32 %v2037_v0, %v2036_v13  ;;  %v2041_v2 = vor.u32 %v2040_v43, %v2039_v47  ;;  %v2044_v12 = vor.u32 %v2043_v3, %v2042_v55  ;;  %v2348_v37 = vshrl.u32 %v3997_v63, %v2347_v16 }
 0x25c   : > { %v2047_v61 = vor.u32 %v2046_v60, %v2045_v1  ;;  %v2050_v23 = vor.u32 %v2049_v62, %v2048_v4  ;;  %v2350_v49 = vshrl.u32 %v3998_v6, %v2347_v16  ;;  %v2353_v34 = vshrl.u32 %v3999_v11, %v2347_v16 }
 0x25d   : > { %v2055_v5 = vsel %vm2051_vm4, %v2035_v30, %v2038_v29  ;;  %v2056_v46 = vsel %vm2054_vm7, %v2044_v12, 2102212464  ;;  %v2059_v14 = vsel %vm2051_vm4, %v2038_v29, %v2041_v2  ;;  %v2063_v26 = vsel %vm2051_vm4, %v2041_v2, %v2044_v12 }
 0x25e   : > { %v2057_v42 = vsel %vm2053_vm6, %v2041_v2, %v2056_v46  ;;  %v2060_v15 = vsel %vm2054_vm7, %v2047_v61, 920167782  ;;  %v2064_v18 = vsel %vm2054_vm7, %v2050_v23, 1326507024  ;;  %v2356_v38 = vshrl.u32 %v3995_v52, %v2347_v16 }
 0x25f   : > { %v2058_v19 = vsel %vm2052_vm5, %v2055_v5, %v2057_v42  ;;  %v2061_v20 = vsel %vm2053_vm6, %v2044_v12, %v2060_v15  ;;  %v2065_v21 = vsel %vm2053_vm6, %v2047_v61, %v2064_v18  ;;  %v2358_v40 = vshll.u32 %v3995_v52, %v2346_v35 }
 0x260   : > { %v2062_v9 = vsel %vm2052_vm5, %v2059_v14, %v2061_v20  ;;  %v2066_v59 = vsel %vm2052_vm5, %v2063_v26, %v2065_v21  ;;  %v2074_v31 = vmul.u32 %v4579_v39, %v2058_v19  ;;  %v2359_v10 = vshrl.u32 %v3994_v44, %v2347_v16  ;;  %v2665_v19 = vpop.permute.xlu0 %2664 }
 0x261   : > { %v4607_v36 = vmul.u32.u64.low %v4579_v39, %v2066_v59  ;;  %v4608_v56 = vmul.u32.u64.high %v4579_v39, %v2066_v59, %v4607_v36  ;;  %v4611_v7 = vmul.u32.u64.low %v4579_v39, %v2062_v9  ;;  %v4612_v48 = vmul.u32.u64.high %v4579_v39, %v2062_v9, %v4611_v7 }
 0x262   : > { %v2361_v33 = vshll.u32 %v3994_v44, %v2346_v35  ;;  %v2351_v54 = vor.u32 %v2350_v49, %v2349_v50  ;;  %v2354_v17 = vor.u32 %v2353_v34, %v2352_v8  ;;  %v2362_v53 = vshrl.u32 %v3996_v57, %v2347_v16  ;;  %v2993_v16 = vpop.permute.xlu1 %2992 }
 0x263   : > { %vm2364_vm8 = vcmp.lt.s32.totalorder %v2345_v58, 1  ;;  %vm2076_vm9 = vc.u32 %v4608_v56, %v4611_v7  ;;  %v2077_v39 = vadd.s32 1, %v4612_v48  ;;  %v2357_v45 = vor.u32 %v2356_v38, %v2355_v28 }
 0x264   : > { %v2380_v13 = vshll.u32 %v2340_v51, 8  ;;  %v2360_v47 = vor.u32 %v2359_v10, %v2358_v40  ;;  %v2363_v55 = vor.u32 %v2362_v53, %v2361_v33  ;;  %vm2365_vm10 = vcmp.lt.s32.totalorder %v2345_v58, 2 }
 0x265   : > { %vm2366_vm11 = vcmp.lt.s32.totalorder %v2345_v58, 3  ;;  %v2078_v1 = vsel %vm2076_vm9, %v2077_v39, %v4612_v48  ;;  %vm2367_vm12 = vcmp.lt.s32.totalorder %v2345_v58, 4  ;;  %v2368_v4 = vsel %vm2364_vm8, %v2348_v37, %v2351_v54 }
 0x266   : > { %v2372_v30 = vsel %vm2364_vm8, %v2351_v54, %v2354_v17  ;;  %v2079_v0 = vadd.s32 %v2078_v1, %v2074_v31  ;;  %v2369_v43 = vsel %vm2367_vm12, %v2357_v45, 2102212464  ;;  %v2373_v3 = vsel %vm2367_vm12, %v2360_v47, 920167782 }
 0x267   : > { %v2376_v60 = vsel %vm2364_vm8, %v2354_v17, %v2357_v45  ;;  %v2370_v62 = vsel %vm2366_vm11, %v2354_v17, %v2369_v43  ;;  %v2374_v29 = vsel %vm2366_vm11, %v2357_v45, %v2373_v3  ;;  %v2377_v2 = vsel %vm2367_vm12, %v2363_v55, 1326507024 }
 0x268   : > { %v2080_v51 = vadd.s32 536870912, %v2079_v0  ;;  %v2375_v12 = vsel %vm2365_vm10, %v2372_v30, %v2374_v29  ;;  %v2378_v41 = vsel %vm2366_vm11, %v2360_v47, %v2377_v2  ;;  %v2371_v61 = vsel %vm2365_vm10, %v2368_v4, %v2370_v62 }
 0x269   : > { %v2379_v23 = vsel %vm2365_vm10, %v2376_v60, %v2378_v41  ;;  %v4634_v35 = vmul.u32.u64.low %v2380_v13, %v2375_v12  ;;  %v4635_v5 = vmul.u32.u64.high %v2380_v13, %v2375_v12, %v4634_v35  ;;  %v2387_v15 = vmul.u32 %v2380_v13, %v2371_v61 }
 0x26a   : > { %v2081_v46 = vshrl.u32 %v2080_v51, 30  ;;  %v4637_v14 = vmul.u32.u64.low %v2380_v13, %v2379_v23  ;;  %v4638_v26 = vmul.u32.u64.high %v2380_v13, %v2379_v23, %v4637_v14  ;;  %v4644_v58 = vmul.f32 %v4561_v27, %v2993_v16 }
 0x26b   : > { %v2390_v18 = vadd.s32 1, %v4635_v5  ;;  %v4647_v50 = vmul.f32 %v4561_v27, %v2665_v19  ;;  %v2075_v39 = vadd.s32 %v4611_v7, %v4608_v56  ;;  %vm2334_vm10 = vcmp.lt.s32.totalorder %v4569_v24, 0 }
 0x26c   : > { %v2082_v42 = vshll.u32 %v2081_v46, 30  ;;  %vm2389_vm13 = vc.u32 %v4638_v26, %v4634_v35  ;;  %v2996_v31 = vand.u32 2147483647, %v4644_v58  ;;  %v2999_v37 = vand.u32 2139095040, %v4644_v58 }
 0x26d   : > { %v2391_v21 = vsel %vm2389_vm13, %v2390_v18, %v4635_v5  ;;  %v2671_v49 = vand.u32 2139095040, %v4647_v50  ;;  %v2105_v17 = vsub.s32 4, %v2081_v46  ;;  %v2668_v13 = vand.u32 2147483647, %v4647_v50 }
 0x26e   : > { %v2083_v20 = vsub.s32 %v2079_v0, %v2082_v42  ;;  %v2392_v59 = vadd.s32 %v2391_v21, %v2387_v15  ;;  %v3000_v8 = vshrl.u32 %v2999_v37, 23  ;;  %v3003_v27 = vand.u32 8388607, %v2996_v31 }
 0x26f   : > { %v2672_v38 = vshrl.u32 %v2671_v49, 23  ;;  %v4668_v3 = vsel %vm2021_vm14, %v2105_v17, %v2081_v46  ;;  %v2388_v2 = vadd.s32 %v4634_v35, %v4638_v26  ;;  %v4678_v41 = vand.u32 8388607, %v2668_v13 }
 0x270   : > { %v2085_v9 = vsub.s32 0, %v2083_v20  ;;  %v2393_v48 = vadd.s32 536870912, %v2392_v59  ;;  %v3547_v40 = vadd.s32 4294967169, %v3000_v8  ;;  %v3004_v55 = vor.u32 8388608, %v3003_v27 }
 0x271   : > { %v3538_v54 = vadd.s32 4294967169, %v2672_v38  ;;  %vm4725_vm11 = vcmp.le.f32.partialorder %v2332_v25, 0.7853982 }
 0x272   : > { %v3521_v36 = vmin.u32 %v2085_v9, %v2083_v20  ;;  %v4652_v28 = vshrl.u32 %v2393_v48, 30  ;;  %v3006_v53 = vadd.s32 1, %v3547_v40  ;;  %v4674_v12 = vshll.u32 %v3004_v55, 8 }
 0x273   : > { %v4663_v1 = vadd.s32 1, %v3538_v54 }
 0x274   : > { %v2087_v34 = vclz %v3521_v36  ;;  %v2395_v33 = vshll.u32 %v4652_v28, 30  ;;  %vm3007_vm2 = vcmp.gt.s32.totalorder %v3006_v53, 0 }
 0x275   : > { %v3008_v56 = vsel %vm3007_vm2, %v3006_v53, 0  ;;  %vm2679_vm5 = vcmp.gt.s32.totalorder %v4663_v1, 0 }
 0x276   : > { %v3522_v10 = vadd.s32 4294967294, %v2087_v34  ;;  %v4660_v45 = vsub.s32 %v2392_v59, %v2395_v33  ;;  %v4671_v29 = vshrl.u32 %v3008_v56, 5  ;;  %v3010_v51 = vand.u32 31, %v3008_v56 }
 0x278   : > { %vm3523_vm15 = vcmp.lt.s32.totalorder %v3522_v10, 0  ;;  %v2398_v43 = vsub.s32 0, %v4660_v45  ;;  %vm3028_vm4 = vcmp.lt.s32.totalorder %v4671_v29, 1  ;;  %v3011_v35 = vsub.s32 32, %v3010_v51 }
 0x279   : > { %v2090_v47 = vsel %vm3523_vm15, 0, %v3522_v10  ;;  %v3013_v14 = vshll.u32 %v3997_v63, %v3010_v51  ;;  %v3016_v26 = vshll.u32 %v3998_v6, %v3010_v51  ;;  %v3019_v42 = vshll.u32 %v3999_v11, %v3010_v51 }
 0x27a   : > { %v2091_v4 = vsub.s32 32, %v2090_v47  ;;  %v2092_v30 = vshll.u32 %v2083_v20, %v2090_v47  ;;  %v2095_v0 = vsub.s32 4294967266, %v2090_v47  ;;  %v3530_v62 = vmin.u32 %v2398_v43, %v4660_v45 }
 0x27b   : > { %v3022_v16 = vshll.u32 %v3995_v52, %v3010_v51  ;;  %v3012_v19 = vshrl.u32 %v3997_v63, %v3011_v35  ;;  %v3014_v20 = vshrl.u32 %v3998_v6, %v3011_v35  ;;  %v3017_v21 = vshrl.u32 %v3999_v11, %v3011_v35 }
 0x27c   : > { %v2093_v7 = vshrl.u32 %v2075_v39, %v2091_v4  ;;  %v2096_v60 = vadd.s32 127, %v2095_v0  ;;  %v2400_v46 = vclz %v3530_v62  ;;  %v3020_v9 = vshrl.u32 %v3995_v52, %v3011_v35 }
 0x27d   : > { %v3023_v37 = vshrl.u32 %v3994_v44, %v3011_v35  ;;  %v3025_v36 = vshll.u32 %v3994_v44, %v3010_v51  ;;  %v3015_v49 = vor.u32 %v3014_v20, %v3013_v14  ;;  %v3018_v8 = vor.u32 %v3017_v21, %v3016_v26 }
 0x27e   : > { %v2094_v23 = vor.u32 %v2093_v7, %v2092_v30  ;;  %v2097_v5 = vshll.u32 %v2096_v60, 23  ;;  %v3531_v32 = vadd.s32 4294967294, %v2400_v46  ;;  %v3021_v34 = vor.u32 %v3020_v9, %v3019_v42 }
 0x27f   : > { %v3024_v33 = vor.u32 %v3023_v37, %v3022_v16  ;;  %v3026_v54 = vshrl.u32 %v3996_v57, %v3011_v35  ;;  %vm3029_vm7 = vcmp.lt.s32.totalorder %v4671_v29, 2  ;;  %vm3030_vm8 = vcmp.lt.s32.totalorder %v4671_v29, 3 }
 0x280   : > { %v2098_v15 = vor.u32 4788187, %v2097_v5  ;;  %v2101_v18 = vcvt.s32.f32 %v2094_v23  ;;  %vm3532_vm6 = vcmp.lt.s32.totalorder %v3531_v32, 0  ;;  %vm3031_vm9 = vcmp.lt.s32.totalorder %v4671_v29, 4 }
 0x281   : > { %v2403_v48 = vsel %vm3532_vm6, 0, %v3531_v32  ;;  %v3027_v47 = vor.u32 %v3026_v54, %v3025_v36  ;;  %v3032_v55 = vsel %vm3028_vm4, %v3012_v19, %v3015_v49  ;;  %v3036_v4 = vsel %vm3028_vm4, %v3015_v49, %v3018_v8 }
 0x282   : > { %v2099_v59 = vand.u32 2147483647, %v2098_v15  ;;  %v2404_v40 = vsub.s32 32, %v2403_v48  ;;  %v2405_v27 = vshll.u32 %v4660_v45, %v2403_v48  ;;  %v2408_v10 = vsub.s32 4294967266, %v2403_v48 }
 0x283   : > { %v3033_v45 = vsel %vm3031_vm9, %v3021_v34, 2102212464  ;;  %v3037_v60 = vsel %vm3031_vm9, %v3024_v33, 920167782  ;;  %v2676_v62 = vor.u32 8388608, %v4678_v41  ;;  %v3040_v35 = vsel %vm3028_vm4, %v3018_v8, %v3021_v34 }
 0x284   : > { %v2102_v38 = vmul.f32 %v2101_v18, %v2099_v59  ;;  %v2406_v53 = vshrl.u32 %v2388_v2, %v2404_v40  ;;  %v2409_v39 = vadd.s32 127, %v2408_v10  ;;  %v3034_v56 = vsel %vm3030_vm8, %v3018_v8, %v3033_v45 }
 0x285   : > { %v2680_v2 = vsel %vm2679_vm5, %v4663_v1, 0  ;;  %v3038_v46 = vsel %vm3030_vm8, %v3021_v34, %v3037_v60  ;;  %v3035_v41 = vsel %vm3029_vm7, %v3032_v55, %v3034_v56  ;;  %v3041_v25 = vsel %vm3031_vm9, %v3027_v47, 1326507024 }
 0x286   : > { %v2103_v17 = vxor.u32 2147483648, %v2102_v38  ;;  %v2407_v0 = vor.u32 %v2406_v53, %v2405_v27  ;;  %v2410_v43 = vshll.u32 %v2409_v39, 23  ;;  %v3039_v1 = vsel %vm3029_vm7, %v3036_v4, %v3038_v46 }
 0x287   : > { %v3042_v26 = vsel %vm3030_vm8, %v3024_v33, %v3041_v25  ;;  %v4742_v42 = vmul.u32.u64.low %v4674_v12, %v3039_v1  ;;  %v4743_v15 = vmul.u32.u64.high %v4674_v12, %v3039_v1, %v4742_v42  ;;  %v2682_v32 = vand.u32 31, %v2680_v2 }
 0x288   : > { %v2104_v30 = vsel %vm2021_vm14, %v2103_v17, %v2102_v38  ;;  %v2411_v23 = vor.u32 4788187, %v2410_v43  ;;  %v2414_v5 = vcvt.s32.f32 %v2407_v0  ;;  %v3043_v18 = vsel %vm3029_vm7, %v3040_v35, %v3042_v26 }
 0x289   : > { %v2107_v7 = vsel %vm4682_vm3, %v4564_v22, %v2104_v30  ;;  %v4748_v16 = vshll.u32 %v2676_v62, 8  ;;  %v4751_v20 = vmul.u32.u64.low %v4674_v12, %v3043_v18  ;;  %v4752_v21 = vmul.u32.u64.high %v4674_v12, %v3043_v18, %v4751_v20 }
 0x28a   : > { %3895 = vcosq.f32 %v2107_v7  ;;  %v2412_v14 = vand.u32 2147483647, %v2411_v23  ;;  %v3051_v9 = vmul.u32 %v4674_v12, %v3035_v41  ;;  %v2681_v59 = vshrl.u32 %v2680_v2, 5 }
 0x28b   : > { %3897 = vsinq.f32 %v2107_v7  ;;  %v2683_v37 = vsub.s32 32, %v2682_v32  ;;  %v2685_v36 = vshll.u32 %v3997_v63, %v2682_v32  ;;  %v2688_v48 = vshll.u32 %v3998_v6, %v2682_v32 }
 0x28c   : > { %v2415_v19 = vmul.f32 %v2414_v5, %v2412_v14  ;;  %v3054_v29 = vadd.s32 1, %v4743_v15  ;;  %v2691_v8 = vshll.u32 %v3999_v11, %v2682_v32  ;;  %v2694_v34 = vshll.u32 %v3995_v52, %v2682_v32 }
 0x28d   : > { %v2686_v38 = vshrl.u32 %v3998_v6, %v2683_v37  ;;  %v2689_v40 = vshrl.u32 %v3999_v11, %v2683_v37  ;;  %v2692_v27 = vshrl.u32 %v3995_v52, %v2683_v37  ;;  %v2108_v12 = vsel %vm4682_vm3, 0, %v4668_v3 }
 0x28e   : > { %v2416_v49 = vxor.u32 2147483648, %v2415_v19  ;;  %vm3053_vm12 = vc.u32 %v4752_v21, %v4742_v42  ;;  %v2684_v33 = vshrl.u32 %v3997_v63, %v2683_v37  ;;  %v2695_v54 = vshrl.u32 %v3994_v44, %v2683_v37 }
 0x28f   : > { %v3055_v6 = vsel %vm3053_vm12, %v3054_v29, %v4743_v15  ;;  %v2687_v17 = vor.u32 %v2686_v38, %v2685_v36  ;;  %v2690_v11 = vor.u32 %v2689_v40, %v2688_v48  ;;  %v2697_v52 = vshll.u32 %v3994_v44, %v2682_v32 }
 0x290   : > { %v2417_v10 = vsel %vm2334_vm10, %v2416_v49, %v2415_v19  ;;  %v3056_v53 = vadd.s32 %v3055_v6, %v3051_v9  ;;  %v2693_v39 = vor.u32 %v2692_v27, %v2691_v8  ;;  %v2696_v61 = vor.u32 %v2695_v54, %v2694_v34  ;;  %v4811_v34 = vld [vmem:[%s5223_s1] sm:$0xf] }
 0x291   : > { %v2112_v3 = vand.u32 3, %v2108_v12  ;;  %v2420_v47 = vsel %vm4725_vm11, %v4569_v24, %v2417_v10  ;;  %v2698_v55 = vshrl.u32 %v3996_v57, %v2683_v37  ;;  %vm2700_vm13 = vcmp.lt.s32.totalorder %v2681_v59, 1  ;;  %v4821_v54 = vld [vmem:[%s5224_s2] sm:$0xf] }
 0x292   : > { %vm2701_vm14 = vcmp.lt.s32.totalorder %v2681_v59, 2  ;;  %v3057_v63 = vadd.s32 536870912, %v3056_v53  ;;  %vm2702_vm15 = vcmp.lt.s32.totalorder %v2681_v59, 3  ;;  %vm2703_vm2 = vcmp.lt.s32.totalorder %v2681_v59, 4 }
 0x293   : > { %v2704_v45 = vsel %vm2700_vm13, %v2684_v33, %v2687_v17  ;;  %v2699_v4 = vor.u32 %v2698_v55, %v2697_v52  ;;  %v2705_v30 = vsel %vm2703_vm2, %v2693_v39, 2102212464  ;;  %v2708_v0 = vsel %vm2700_vm13, %v2687_v17, %v2690_v11 }
 0x294   : > { %v2709_v44 = vsel %vm2703_vm2, %v2696_v61, 920167782  ;;  %v4778_v56 = vshrl.u32 %v3057_v63, 30  ;;  %v2706_v7 = vsel %vm2702_vm15, %v2690_v11, %v2705_v30  ;;  %v2712_v62 = vsel %vm2700_vm13, %v2690_v11, %v2693_v39 }
 0x295   : > { %v2710_v60 = vsel %vm2702_vm15, %v2693_v39, %v2709_v44  ;;  %v2418_v57 = vsub.s32 4, %v4652_v28  ;;  %3899 = vcosq.f32 %v2420_v47  ;;  %v2713_v23 = vsel %vm2703_vm2, %v2699_v4, 1326507024 }
 0x296   : > { %v2711_v2 = vsel %vm2701_vm14, %v2708_v0, %v2710_v60  ;;  %3901 = vsinq.f32 %v2420_v47  ;;  %v3059_v46 = vshll.u32 %v4778_v56, 30  ;;  %v2714_v35 = vsel %vm2702_vm15, %v2696_v61, %v2713_v23 }
 0x297   : > { %v3896_v43 = vpop.eup %3895  ;;  %v2226_v41 = vlaneseq  ;;  %v2707_v1 = vsel %vm2701_vm14, %v2704_v45, %v2706_v7  ;;  %v2715_v25 = vsel %vm2701_vm14, %v2712_v62, %v2714_v35  ;;  %vm2114_vm3 = vcmp.eq.s32.totalorder %v2112_v3, 0 }
 0x298   : > { %v3898_v5 = vpop.eup %3897  ;;  %v4789_v14 = vmul.u32.u64.low %v4748_v16, %v2711_v2  ;;  %v4790_v26 = vmul.u32.u64.high %v4748_v16, %v2711_v2, %v4789_v14  ;;  %v4793_v15 = vsub.s32 %v3056_v53, %v3059_v46  ;;  %vm2111_vm4 = vweird.f32 %v4564_v22 }
 0x299   : > { %v4796_v18 = vmul.u32.u64.low %v4748_v16, %v2715_v25  ;;  %v4797_v32 = vmul.u32.u64.high %v4748_v16, %v2715_v25, %v4796_v18  ;;  %v2115_v19 = vxor.u32 2147483648, %v3898_v5  ;;  %vm2117_vm5 = vcmp.eq.s32.totalorder %v2112_v3, 2 }
 0x29a   : > { %v2118_v20 = vxor.u32 2147483648, %v3896_v43  ;;  %v3062_v9 = vsub.s32 0, %v4793_v15  ;;  %v2723_v59 = vmul.u32 %v4748_v16, %v2707_v1  ;;  %vm2113_vm6 = vcmp.lt.s32.totalorder %v2112_v3, 2 }
 0x29b   : > { %v2215_v37 = vadd.s32 3, %v2108_v12  ;;  %v2726_v36 = vadd.s32 1, %v4790_v26  ;;  %v2116_v48 = vsel %vm2114_vm3, %v3896_v43, %v2115_v19  ;;  %v4803_v29 = vshrl.u32 %v2226_v41, 7 }
 0x29c   : > { %v2119_v49 = vsel %vm2117_vm5, %v2118_v20, %v3898_v5  ;;  %v3548_v8 = vmin.u32 %v3062_v9, %v4793_v15  ;;  %vm2725_vm7 = vc.u32 %v4797_v32, %v4789_v14  ;;  %v2419_v12 = vsel %vm2334_vm10, %v2418_v57, %v4652_v28 }
 0x29d   : > { %v2727_v16 = vsel %vm2725_vm7, %v2726_v36, %v4790_v26  ;;  %v2120_v38 = vsel %vm2113_vm6, %v2116_v48, %v2119_v49  ;;  %v2216_v40 = vand.u32 3, %v2215_v37  ;;  %v2228_v27 = vsub.s32 0, %v4803_v29 }
 0x29e   : > { %v3064_v10 = vclz %v3548_v8  ;;  %v2728_v33 = vadd.s32 %v2727_v16, %v2723_v59  ;;  %v4825_v6 = vsel %vm2111_vm4, nan, %v2120_v38  ;;  %v2421_v55 = vsel %vm4725_vm11, 0, %v2419_v12 }
 0x29f   : > { %vm2217_vm8 = vcmp.lt.s32.totalorder %v2216_v40, 2  ;;  %vm2218_vm9 = vcmp.eq.s32.totalorder %v2216_v40, 0  ;;  %vm2221_vm12 = vcmp.eq.s32.totalorder %v2216_v40, 2  ;;  %v4828_v17 = vrot.slane %v4811_v34, %v2228_v27 }
 0x2a0   : > { %v3549_v28 = vadd.s32 4294967294, %v3064_v10  ;;  %v2729_v52 = vadd.s32 536870912, %v2728_v33  ;;  %v2220_v53 = vsel %vm2218_vm9, %v3896_v43, %v2115_v19  ;;  %v2223_v39 = vsel %vm2221_vm12, %v2118_v20, %v3898_v5 }
 0x2a1   : > { %v2224_v61 = vsel %vm2217_vm8, %v2220_v53, %v2223_v39  ;;  %v4834_v3 = vmul.f32 %v4828_v17, %v4825_v6  ;;  %v4837_v47 = vrot.slane %v4821_v54, %v2228_v27  ;;  %v2425_v30 = vand.u32 3, %v2421_v55 }
 0x2a2   : > { %v3900_v63 = vpop.eup %3899  ;;  %vm3550_vm10 = vcmp.lt.s32.totalorder %v3549_v28, 0  ;;  %v4841_v45 = vshrl.u32 %v2729_v52, 30  ;;  %v4845_v4 = vsel %vm2111_vm4, nan, %v2224_v61  ;;  %v2528_v2 = vadd.s32 3, %v2421_v55 }
 0x2a3   : > { %v3902_v0 = vpop.eup %3901  ;;  %v4849_v44 = vmul.f32 %v4837_v47, %v4845_v4  ;;  %v3067_v51 = vsel %vm3550_vm10, 0, %v3549_v28  ;;  %vm2427_vm11 = vcmp.eq.s32.totalorder %v2425_v30, 0  ;;  %vm2430_vm13 = vcmp.eq.s32.totalorder %v2425_v30, 2 }
 0x2a4   : > { %v4830_v11 = vpop.f32.mrf.mxu1  ;;  %v2731_v7 = vshll.u32 %v4841_v45, 30  ;;  %v2428_v57 = vxor.u32 2147483648, %v3902_v0  ;;  %v2431_v22 = vxor.u32 2147483648, %v3900_v63  ;;  %v3072_v5 = vsub.s32 4294967266, %v3067_v51 }
 0x2a5   : > { %vm2426_vm14 = vcmp.lt.s32.totalorder %v2425_v30, 2  ;;  %v2529_v1 = vand.u32 3, %v2528_v2  ;;  %v2541_v25 = vsub.s32 1, %v4803_v29  ;;  %v3052_v26 = vadd.s32 %v4742_v42, %v4752_v21 }
 0x2a6   : > { %v4851_v43 = vpop.f32.mrf.mxu1  ;;  %v2732_v62 = vsub.s32 %v2728_v33, %v2731_v7  ;;  %v2429_v35 = vsel %vm2427_vm11, %v3900_v63, %v2428_v57  ;;  %v2432_v41 = vsel %vm2430_vm13, %v2431_v22, %v3902_v0  ;;  %v3068_v18 = vsub.s32 32, %v3067_v51 }
 0x2a7   : > { %vm2424_vm15 = vweird.f32 %v4569_v24  ;;  %v2433_v20 = vsel %vm2426_vm14, %v2429_v35, %v2432_v41  ;;  %vm2530_vm2 = vcmp.lt.s32.totalorder %v2529_v1, 2  ;;  %vm2531_vm3 = vcmp.eq.s32.totalorder %v2529_v1, 0 }
 0x2a8   : > { %v2734_v46 = vsub.s32 0, %v2732_v62  ;;  %vm2534_vm4 = vcmp.eq.s32.totalorder %v2529_v1, 2  ;;  %v3073_v9 = vadd.s32 127, %v3072_v5  ;;  %v2533_v37 = vsel %vm2531_vm3, %v3900_v63, %v2428_v57 }
 0x2a9   : > { %v2536_v36 = vsel %vm2534_vm4, %v2431_v22, %v3902_v0  ;;  %v4861_v49 = vrot.slane %v4811_v34, %v2541_v25  ;;  %v4864_v8 = vrot.slane %v4821_v54, %v2541_v25  ;;  %v4866_v16 = vsel %vm2424_vm15, nan, %v2433_v20 }
 0x2aa   : > { %v3539_v19 = vmin.u32 %v2734_v46, %v2732_v62  ;;  %v2537_v48 = vsel %vm2530_vm2, %v2533_v37, %v2536_v36  ;;  %v2724_v38 = vadd.s32 %v4789_v14, %v4797_v32  ;;  %v3069_v33 = vshll.u32 %v4793_v15, %v3067_v51 }
 0x2ab   : > { %v4868_v24 = vsel %vm2424_vm15, nan, %v2537_v48  ;;  %v2543_v27 = vmul.f32 %v4861_v49, %v4866_v16  ;;  %v3070_v28 = vshrl.u32 %v3052_v26, %v3068_v18  ;;  %v3074_v52 = vshll.u32 %v3073_v9, 23 }
 0x2ac   : > { %v3653_v60 = vpop.f32.mrf.mxu1  ;;  %v2736_v59 = vclz %v3539_v19  ;;  %v2548_v40 = vmul.f32 %v4864_v8, %v4868_v24  ;;  %v4877_v12 = vpop.f32.mrf.mxu0  ;;  %vm2998_vm6 = vcmp.lt.s32.totalorder %v4644_v58, 0  ;;  %v4898_v20 = vadd.f32 %v4849_v44, %v4834_v3 }
 0x2ad   : > { %1863 = vrot.lane.b32.xlu0 %v3653_v60, %s4004_s20  ;;  %v3071_v55 = vor.u32 %v3070_v28, %v3069_v33  ;;  %v3075_v63 = vor.u32 4788187, %v3074_v52  ;;  %vm2670_vm7 = vcmp.lt.s32.totalorder %v4647_v50, 0  ;;  %vm4903_vm8 = vcmp.le.f32.partialorder %v2996_v31, 0.7853982 }
 0x2ae   : > { %v1058_v23 = vpop.f32.mrf.mxu1  ;;  %v3540_v21 = vadd.s32 4294967294, %v2736_v59  ;;  %v4881_v32 = vpop.f32.mrf.mxu0  ;;  %v4005_v37 = vmov 0.0   ;;  %vm4931_vm9 = vcmp.le.f32.partialorder %v2668_v13, 0.7853982  ;;  %v4937_v36 = vadd.f32 %v2548_v40, %v2543_v27 }
 0x2af   : > { %1861 = vrot.lane.b32.xlu1 %v1058_v23, %s4004_s20  ;;  %v3076_v51 = vand.u32 2147483647, %v3075_v63  ;;  %v3078_v22 = vcvt.s32.f32 %v3071_v55  ;;  %1978 = vst.msk [vmem:[#allocation2 + $0x18] sm:$0xff] %vm541_vm0, %v4005_v37  ;;  %1975 = vst.msk [vmem:[#allocation2] sm:$0xff] %vm541_vm0, %v4005_v37  ;;  %3688 = vmatprep.subr.mxu0 %v4005_v37  ;;  %v2754_v28 = vsub.s32 4, %v4841_v45  ;;  %vm2760_vm4 = vweird.f32 %v4647_v50 }
 0x2b0   : > { %vm3541_vm5 = vcmp.lt.s32.totalorder %v3540_v21, 0  ;;  %1976 = vst.msk [vmem:[#allocation2 + $0x8] sm:$0xff] %vm541_vm0, %v4005_v37  ;;  %1977 = vst.msk [vmem:[#allocation2 + $0x10] sm:$0xff] %vm541_vm0, %v4005_v37  ;;  %3707 = vmatprep.subr.mxu1 %v4005_v37 }
 0x2b1   : > { %v2739_v53 = vsel %vm3541_vm5, 0, %v3540_v21  ;;  %v3079_v41 = vmul.f32 %v3078_v22, %v3076_v51  ;;  %1979 = vst.msk [vmem:[#allocation2 + $0x20] sm:$0xff] %vm541_vm0, %v4005_v37  ;;  %1980 = vst.msk [vmem:[#allocation2 + $0x28] sm:$0xff] %vm541_vm0, %v4005_v37  ;;  %vm3088_vm5 = vweird.f32 %v4644_v58 }
 0x2b2   : > { %v2740_v39 = vsub.s32 32, %v2739_v53  ;;  %v2741_v61 = vshll.u32 %v2732_v62, %v2739_v53  ;;  %v2744_v14 = vsub.s32 4294967266, %v2739_v53  ;;  %1981 = vst.msk [vmem:[#allocation2 + $0x30] sm:$0xff] %vm541_vm0, %v4005_v37  ;;  %1982 = vst.msk [vmem:[#allocation2 + $0x38] sm:$0xff] %vm541_vm0, %v4005_v37 }
 0x2b3   : > { %v3080_v26 = vxor.u32 2147483648, %v3079_v41 }
 0x2b4   : > { %v3656_v42 = vpop.f32.mrf.mxu1  ;;  %v2742_v30 = vshrl.u32 %v2724_v38, %v2740_v39  ;;  %v2745_v0 = vadd.s32 127, %v2744_v14  ;;  %v4883_v7 = vpop.f32.mrf.mxu0  ;;  %v3082_v38 = vsub.s32 4, %v4778_v56 }
 0x2b5   : > { %1867 = vrot.lane.b32.xlu0 %v3656_v42, %s4004_s20  ;;  %v3081_v59 = vsel %vm2998_vm6, %v3080_v26, %v3079_v41 }
 0x2b6   : > { %v1068_v10 = vpop.f32.mrf.mxu1  ;;  %v2743_v57 = vor.u32 %v2742_v30, %v2741_v61  ;;  %v2746_v15 = vshll.u32 %v2745_v0, 23  ;;  %v4886_v23 = vpop.f32.mrf.mxu0  ;;  %v3084_v48 = vsel %vm4903_vm8, %v4644_v58, %v3081_v59  ;;  %v2755_v61 = vsel %vm2670_vm7, %v2754_v28, %v4841_v45 }
 0x2b7   : > { %1865 = vrot.lane.b32.xlu1 %v1068_v10, %s4004_s20  ;;  %3903 = vcosq.f32 %v3084_v48  ;;  %v3083_v10 = vsel %vm2998_vm6, %v3082_v38, %v4778_v56  ;;  %v2237_v58 = vmul.f32 %v4828_v17, %v4845_v4  ;;  %v2550_v17 = vmul.f32 %v4861_v49, %v4868_v24  ;;  %v1986_v24 = vld [vmem:[#allocation2 + $0x18] sm:$0xff] }
 0x2b8   : > { %v2747_v2 = vor.u32 4788187, %v2746_v15  ;;  %v2750_v46 = vcvt.s32.f32 %v2743_v57  ;;  %3905 = vsinq.f32 %v3084_v48  ;;  %v3085_v52 = vsel %vm4903_vm8, 0, %v3083_v10 }
 0x2b9   : > { %v3192_v55 = vadd.s32 3, %v3085_v52  ;;  %v2757_v57 = vsel %vm4931_vm9, 0, %v2755_v61 }
 0x2ba   : > { %v2748_v5 = vand.u32 2147483647, %v2747_v2  ;;  %v2864_v51 = vadd.s32 3, %v2757_v57  ;;  %v2761_v45 = vand.u32 3, %v2757_v57 }
 0x2bb   : > { %v3193_v22 = vand.u32 3, %v3192_v55 }
 0x2bc   : > { %v3659_v60 = vpop.f32.mrf.mxu1  ;;  %v4889_v35 = vpop.f32.mrf.mxu0  ;;  %v2751_v1 = vmul.f32 %v2750_v46, %v2748_v5  ;;  %v2865_v2 = vand.u32 3, %v2864_v51  ;;  %vm2763_vm11 = vcmp.eq.s32.totalorder %v2761_v45, 0  ;;  %vm2766_vm13 = vcmp.eq.s32.totalorder %v2761_v45, 2 }
 0x2bd   : > { %1871 = vrot.lane.b32.xlu1 %v3659_v60, %s4004_s20  ;;  %v3089_v60 = vand.u32 3, %v3085_v52  ;;  %vm2762_vm2 = vcmp.lt.s32.totalorder %v2761_v45, 2  ;;  %vm3195_vm8 = vcmp.eq.s32.totalorder %v3193_v22, 0 }
 0x2be   : > { %v1078_v62 = vpop.f32.mrf.mxu1  ;;  %v4891_v25 = vpop.f32.mrf.mxu0  ;;  %v2752_v19 = vxor.u32 2147483648, %v2751_v1  ;;  %vm2867_vm14 = vcmp.eq.s32.totalorder %v2865_v2, 0  ;;  %vm2870_vm15 = vcmp.eq.s32.totalorder %v2865_v2, 2  ;;  %vm2866_vm3 = vcmp.lt.s32.totalorder %v2865_v2, 2 }
 0x2bf   : > { %vm3091_vm12 = vcmp.eq.s32.totalorder %v3089_v60, 0  ;;  %vm3094_vm10 = vcmp.eq.s32.totalorder %v3089_v60, 2  ;;  %vm3090_vm6 = vcmp.lt.s32.totalorder %v3089_v60, 2 }
 0x2c0   : > { %v2753_v44 = vsel %vm2670_vm7, %v2752_v19, %v2751_v1  ;;  %vm3194_vm7 = vcmp.lt.s32.totalorder %v3193_v22, 2 }
 0x2c1   : > { %1869 = vrot.lane.b32.xlu1 %v1078_v62, %s4004_s20  ;;  %v2756_v21 = vsel %vm4931_vm9, %v4647_v50, %v2753_v44  ;;  %vm3198_vm9 = vcmp.eq.s32.totalorder %v3193_v22, 2 }
 0x2c2   : > { %3907 = vcosq.f32 %v2756_v21 }
 0x2c3   : > { %3909 = vsinq.f32 %v2756_v21 }
 0x2c4   : > { %v4894_v18 = vpop.f32.mrf.mxu0  ;;  %v4965_v14 = vpop.eup %3903 }
 0x2c5   : > { %v3906_v63 = vpop.eup %3905  ;;  %v3095_v5 = vxor.u32 2147483648, %v4965_v14 }
 0x2c6   : > { %v4927_v31 = vpop.f32.mrf.mxu0  ;;  %v3092_v62 = vxor.u32 2147483648, %v3906_v63 }
 0x2c7   : > { %v3096_v50 = vsel %vm3094_vm10, %v3095_v5, %v3906_v63  ;;  %vm1953_vm10 = vcmask 130048  }
 0x2c8   : > { %v3093_v28 = vsel %vm3091_vm12, %v4965_v14, %v3092_v62  ;;  %v3197_v57 = vsel %vm3195_vm8, %v4965_v14, %v3092_v62  ;;  %v2238_v62 = vmul.f32 %v4837_v47, %v4825_v6  ;;  %vm4008_vm12 = vmmov 0  }
 0x2c9   : > { %v3097_v61 = vsel %vm3090_vm6, %v3093_v28, %v3096_v50  ;;  %3704 = vmatprep.mubr.msk.f32.mxu0 %vm4008_vm12, %v4005_v37  ;;  %3723 = vmatprep.mubr.msk.f32.mxu1 %vm4008_vm12, %v4005_v37  ;;  %v2551_v6 = vmul.f32 %v4864_v8, %v4866_v16 }
 0x2ca   : > { %v4999_v60 = vsel %vm3088_vm5, nan, %v3097_v61 }
 0x2cb   : > { %v2552_v47 = vsub.f32 %v2550_v17, %v2551_v6  ;;  %v1985_v17 = vld [vmem:[#allocation2 + $0x10] sm:$0xff] }
 0x2cc   : > { %v4942_v42 = vpop.f32.mrf.mxu0 }
 0x2ce   : > { %v4947_v13 = vpop.f32.mrf.mxu0 }
 0x2cf   : > { %v3908_v0 = vpop.eup %3907 }
 0x2d0   : > { %v3910_v15 = vpop.eup %3909  ;;  %v2767_v41 = vxor.u32 2147483648, %v3908_v0 }
 0x2d1   : > { %v2764_v46 = vxor.u32 2147483648, %v3910_v15 }
 0x2d2   : > { %v2768_v19 = vsel %vm2766_vm13, %v2767_v41, %v3910_v15  ;;  %v2872_v48 = vsel %vm2870_vm15, %v2767_v41, %v3910_v15  ;;  %v3200_v15 = vsel %vm3198_vm9, %v3095_v5, %v3906_v63  ;;  %vm2253_vm13 = vcmask 523264  }
 0x2d3   : > { %v4955_v33 = vpop.f32.mrf.mxu1  ;;  %v2765_v26 = vsel %vm2763_vm11, %v3908_v0, %v2764_v46  ;;  %v2869_v44 = vsel %vm2867_vm14, %v3908_v0, %v2764_v46  ;;  %v3201_v22 = vsel %vm3194_vm7, %v3197_v57, %v3200_v15  ;;  %vm1962_vm11 = vcmask 195584  }
 0x2d4   : > { %v3667_v40 = vpop.f32.mrf.mxu0  ;;  %v2769_v3 = vsel %vm2762_vm2, %v2765_v26, %v2768_v19  ;;  %v2873_v38 = vsel %vm2866_vm3, %v2869_v44, %v2872_v48  ;;  %v5013_v46 = vsel %vm3088_vm5, nan, %v3201_v22 }
 0x2d5   : > { %1895 = vrot.lane.b32.xlu0 %v3667_v40, %s4006_s11  ;;  %v4960_v53 = vpop.f32.mrf.mxu1  ;;  %v4975_v21 = vsel %vm2760_vm4, nan, %v2769_v3  ;;  %v2877_v40 = vsub.s32 2, %v4803_v29  ;;  %v4979_v10 = vsel %vm2760_vm4, nan, %v2873_v38  ;;  %v1988_v3 = vld [vmem:[#allocation2 + $0x28] sm:$0xff] }
 0x2d6   : > { %v1439_v27 = vpop.f32.mrf.mxu0 }
 0x2d7   : > { %1893 = vrot.lane.b32.xlu1 %v1439_v27, %s4006_s11  ;;  %v4986_v52 = vrot.slane %v4811_v34, %v2877_v40 }
 0x2db   : > { %v3681_v30 = vpop.f32.mrf.mxu1 }
 0x2dc   : > { %v3670_v39 = vpop.f32.mrf.mxu0  ;;  %1927 = vrot.lane.b32.xlu0 %v3681_v30, %s4007_s13  ;;  %v3205_v30 = vsub.s32 3, %v4803_v29 }
 0x2dd   : > { %v1820_v1 = vpop.f32.mrf.mxu1 }
 0x2de   : > { %v1449_v56 = vpop.f32.mrf.mxu0  ;;  %v5003_v51 = vrot.slane %v4811_v34, %v3205_v30  ;;  %v5006_v29 = vrot.slane %v4821_v54, %v3205_v30 }
 0x2df   : > { %1897 = vrot.lane.b32.xlu1 %v1449_v56, %s4006_s11  ;;  %v2879_v56 = vmul.f32 %v4986_v52, %v4975_v21 }
 0x2e0   : > { %1899 = vrot.lane.b32.xlu0 %v3670_v39, %s4006_s11  ;;  %v4989_v39 = vrot.slane %v4821_v54, %v2877_v40  ;;  %v3207_v14 = vmul.f32 %v5003_v51, %v4999_v60  ;;  %v3212_v34 = vmul.f32 %v5006_v29, %v5013_v46  ;;  %v1987_v40 = vld [vmem:[#allocation2 + $0x20] sm:$0xff] }
 0x2e2   : > { %v2884_v0 = vmul.f32 %v4989_v39, %v4979_v10  ;;  %v5021_v63 = vadd.f32 %v3212_v34, %v3207_v14 }
 0x2e3   : > { %v3684_v9 = vpop.f32.mrf.mxu1 }
 0x2e4   : > { %v3673_v59 = vpop.f32.mrf.mxu0  ;;  %1931 = vrot.lane.b32.xlu0 %v3684_v9, %s4007_s13  ;;  %v5009_v45 = vadd.f32 %v2884_v0, %v2879_v56 }
 0x2e5   : > { %v1830_v27 = vpop.f32.mrf.mxu1 }
 0x2e6   : > { %1929 = vrot.lane.b32.xlu1 %v1830_v27, %s4007_s13  ;;  %v1459_v55 = vpop.f32.mrf.mxu0 }
 0x2e8   : > { %1903 = vrot.lane.b32.xlu0 %v3673_v59, %s4006_s11 }
 0x2ea   : > { %1901 = vrot.lane.b32.xlu1 %v1459_v55, %s4006_s11 }
 0x2eb   : > { %v3687_v2 = vpop.f32.mrf.mxu1 }
 0x2ec   : > { %1935 = vrot.lane.b32.xlu0 %v3687_v2, %s4007_s13  ;;  %v1989_v2 = vld [vmem:[#allocation2 + $0x30] sm:$0xff] }
 0x2ed   : > { %v1840_v54 = vpop.f32.mrf.mxu1 }
 0x2ee   : > { %1933 = vrot.lane.b32.xlu1 %v1840_v54, %s4007_s13 }
 0x2f0   : > { %1859 = vrot.lane.b32.xlu0 %v4830_v11, %s4004_s20  ;;  %v2239_v11 = vsub.f32 %v2237_v58, %v2238_v62 }
 0x2f2   : > { %1925 = vrot.lane.b32.xlu1 %v1820_v1, %s4007_s13 }
 0x2f4   : > { %1891 = vrot.lane.b32.xlu0 %v4942_v42, %s4006_s11 }
 0x2f6   : > { %1857 = vrot.lane.b32.xlu1 %v4851_v43, %s4004_s20 }
 0x2f8   : > { %1923 = vrot.lane.b32.xlu0 %v4955_v33, %s4007_s13 }
 0x2fa   : > { %1889 = vrot.lane.b32.xlu1 %v4947_v13, %s4006_s11 }
 0x2fc   : > { %1921 = vrot.lane.b32.xlu0 %v4960_v53, %s4007_s13 }
 0x300   : > { %2241 = vrot.lane.b32.xlu0 %v2239_v11, %s4000_s27 }
 0x304   : > { %2554 = vrot.lane.b32.xlu0 %v2552_v47, %s4000_s27 }
 0x31f   : > { %v1864_v43 = vpop.permute.xlu0 %1863 }
 0x320   : > { %v1948_v49 = vsel %vm575_vm1, %v4883_v7, %v1864_v43 }
 0x321   : > { %v1862_v4 = vpop.permute.xlu1 %1861 }
 0x322   : > { %v1947_v11 = vsel %vm575_vm1, %v4886_v23, %v1862_v4 }
 0x327   : > { %v1868_v33 = vpop.permute.xlu0 %1867 }
 0x328   : > { %v1950_v59 = vsel %vm575_vm1, %v4889_v35, %v1868_v33 }
 0x329   : > { %v1866_v42 = vpop.permute.xlu1 %1865 }
 0x32a   : > { %v1949_v7 = vsel %vm575_vm1, %v4891_v25, %v1866_v42  ;;  %v1990_v25 = vld [vmem:[#allocation2 + $0x38] sm:$0xff] }
 0x32f   : > { %v1872_v13 = vpop.permute.xlu1 %1871 }
 0x330   : > { %v1952_v56 = vsel %vm575_vm1, %v4894_v18, %v1872_v13 }
 0x333   : > { %v1870_v41 = vpop.permute.xlu1 %1869 }
 0x334   : > { %v1951_v15 = vsel %vm575_vm1, %v4927_v31, %v1870_v41 }
 0x347   : > { %v1896_v5 = vpop.permute.xlu0 %1895 }
 0x348   : > { %v1957_v8 = vsel %vm1953_vm10, %v1948_v49, %v1896_v5  ;;  %v1984_v5 = vld [vmem:[#allocation2 + $0x8] sm:$0xff] }
 0x349   : > { %v1894_v16 = vpop.permute.xlu1 %1893 }
 0x34a   : > { %v1956_v6 = vsel %vm1953_vm10, %v1947_v11, %v1894_v16 }
 0x34e   : > { %v1928_v53 = vpop.permute.xlu0 %1927 }
 0x34f   : > { %v1966_v1 = vsel %vm1962_vm11, %v1957_v8, %v1928_v53 }
 0x350   : > { %v1994_v26 = vadd.f32 %v1986_v24, %v1966_v1 }
 0x351   : > { %v1898_v9 = vpop.permute.xlu1 %1897 }
 0x352   : > { %2002 = vst.msk [vmem:[#allocation2 + $0x18] sm:$0xff] %vm541_vm0, %v1994_v26  ;;  %v1900_v19 = vpop.permute.xlu0 %1899  ;;  %v1958_v27 = vsel %vm1953_vm10, %v1949_v7, %v1898_v9 }
 0x353   : > { %v1959_v44 = vsel %vm1953_vm10, %v1950_v59, %v1900_v19 }
 0x356   : > { %v1932_v48 = vpop.permute.xlu0 %1931 }
 0x357   : > { %v1968_v38 = vsel %vm1962_vm11, %v1959_v44, %v1932_v48 }
 0x358   : > { %v1996_v28 = vadd.f32 %v1988_v3, %v1968_v38  ;;  %v1930_v50 = vpop.permute.xlu1 %1929 }
 0x359   : > { %v1967_v61 = vsel %vm1962_vm11, %v1958_v27, %v1930_v50  ;;  %v2248_v44 = vld [vmem:[#allocation2 + $0x18] sm:$0xff]  ;;  %v2887_v27 = vmul.f32 %v4989_v39, %v4975_v21  ;;  %v3214_v50 = vmul.f32 %v5003_v51, %v5013_v46 }
 0x35a   : > { %2004 = vst.msk [vmem:[#allocation2 + $0x28] sm:$0xff] %vm541_vm0, %v1996_v28  ;;  %v1995_v55 = vadd.f32 %v1987_v40, %v1967_v61  ;;  %v1904_v35 = vpop.permute.xlu0 %1903  ;;  %v3215_v61 = vmul.f32 %v5006_v29, %v4999_v60 }
 0x35b   : > { %v1961_v0 = vsel %vm1953_vm10, %v1952_v56, %v1904_v35 }
 0x35c   : > { %2003 = vst.msk [vmem:[#allocation2 + $0x20] sm:$0xff] %vm541_vm0, %v1995_v55  ;;  %v1902_v30 = vpop.permute.xlu1 %1901  ;;  %v3216_v55 = vsub.f32 %v3214_v50, %v3215_v61 }
 0x35d   : > { %v1960_v14 = vsel %vm1953_vm10, %v1951_v15, %v1902_v30 }
 0x35e   : > { %v1936_v57 = vpop.permute.xlu0 %1935 }
 0x35f   : > { %v1970_v22 = vsel %vm1962_vm11, %v1961_v0, %v1936_v57 }
 0x360   : > { %v1998_v34 = vadd.f32 %v1990_v25, %v1970_v22  ;;  %v1934_v54 = vpop.permute.xlu1 %1933 }
 0x361   : > { %v1969_v58 = vsel %vm1962_vm11, %v1960_v14, %v1934_v54  ;;  %v2250_v26 = vld [vmem:[#allocation2 + $0x28] sm:$0xff] }
 0x362   : > { %2006 = vst.msk [vmem:[#allocation2 + $0x38] sm:$0xff] %vm541_vm0, %v1998_v34  ;;  %v1997_v62 = vadd.f32 %v1989_v2, %v1969_v58  ;;  %v1860_v18 = vpop.permute.xlu0 %1859 }
 0x363   : > { %v1946_v13 = vsel %vm575_vm1, %v4877_v12, %v1860_v18  ;;  %v1983_v12 = vld [vmem:[#allocation2] sm:$0xff] }
 0x364   : > { %2005 = vst.msk [vmem:[#allocation2 + $0x30] sm:$0xff] %vm541_vm0, %v1997_v62  ;;  %v1926_v31 = vpop.permute.xlu1 %1925  ;;  %v2249_v59 = vld [vmem:[#allocation2 + $0x20] sm:$0xff] }
 0x365   : > { %v1965_v47 = vsel %vm1962_vm11, %v1956_v6, %v1926_v31 }
 0x366   : > { %v1993_v43 = vadd.f32 %v1985_v17, %v1965_v47  ;;  %v1892_v42 = vpop.permute.xlu0 %1891 }
 0x367   : > { %v1955_v23 = vsel %vm1953_vm10, %v1946_v13, %v1892_v42 }
 0x368   : > { %2001 = vst.msk [vmem:[#allocation2 + $0x10] sm:$0xff] %vm541_vm0, %v1993_v43  ;;  %v1858_v33 = vpop.permute.xlu1 %1857 }
 0x369   : > { %v2252_v41 = vld [vmem:[#allocation2 + $0x38] sm:$0xff]  ;;  %v1945_v8 = vsel %vm575_vm1, %v4881_v32, %v1858_v33 }
 0x36a   : > { %v1924_v4 = vpop.permute.xlu0 %1923  ;;  %3689 = vmatpush3.msra.mxu0 %v2252_v41 }
 0x36b   : > { %v1964_v49 = vsel %vm1962_vm11, %v1955_v23, %v1924_v4  ;;  %3690 = vmatprep.subr.mxu0 %v4005_v37  ;;  %v2251_v24 = vld [vmem:[#allocation2 + $0x30] sm:$0xff] }
 0x36c   : > { %v1992_v16 = vadd.f32 %v1984_v5, %v1964_v49  ;;  %3691 = vmatpush3.msra.mxu0 %v2251_v24  ;;  %v1890_v53 = vpop.permute.xlu1 %1889 }
 0x36d   : > { %v1954_v1 = vsel %vm1953_vm10, %v1945_v8, %v1890_v53  ;;  %3692 = vmatprep.subr.mxu0 %v4005_v37 }
 0x36e   : > { %2000 = vst.msk [vmem:[#allocation2 + $0x8] sm:$0xff] %vm541_vm0, %v1992_v16  ;;  %v1922_v19 = vpop.permute.xlu0 %1921  ;;  %3693 = vmatpush3.msra.mxu0 %v2250_v26 }
 0x36f   : > { %v1963_v9 = vsel %vm1962_vm11, %v1954_v1, %v1922_v19  ;;  %3694 = vmatprep.subr.mxu0 %v4005_v37  ;;  %v2247_v3 = vld [vmem:[#allocation2 + $0x10] sm:$0xff] }
 0x370   : > { %v1991_v32 = vadd.f32 %v1983_v12, %v1963_v9  ;;  %3695 = vmatpush3.msra.mxu0 %v2249_v59  ;;  %2570 = vrot.lane.b32.xlu0 %v2247_v3, %s4002_s30 }
 0x371   : > { %3696 = vmatprep.subr.mxu0 %v4005_v37 }
 0x372   : > { %1999 = vst.msk [vmem:[#allocation2] sm:$0xff] %vm541_vm0, %v1991_v32  ;;  %3697 = vmatpush3.msra.mxu0 %v2248_v44  ;;  %v2242_v7 = vpop.permute.xlu0 %2241 }
 0x373   : > { %3698 = vmatprep.subr.mxu0 %v4005_v37  ;;  %v2244_v40 = vsel %vm541_vm0, %v4898_v20, %v2242_v7  ;;  %v2886_v20 = vmul.f32 %v4986_v52, %v4979_v10 }
 0x374   : > { %3232 = vrot.lane.b32.xlu0 %v2250_v26, %s4003_s8  ;;  %3699 = vmatpush3.msra.mxu0 %v2247_v3 }
 0x375   : > { %3700 = vmatprep.subr.mxu0 %v4005_v37  ;;  %v2246_v48 = vld [vmem:[#allocation2 + $0x8] sm:$0xff]  ;;  %v2888_v28 = vsub.f32 %v2886_v20, %v2887_v27 }
 0x376   : > { %2568 = vrot.lane.b32.xlu1 %v2246_v48, %s4002_s30  ;;  %3701 = vmatpush3.msra.mxu0 %v2246_v48  ;;  %v2555_v35 = vpop.permute.xlu0 %2554 }
 0x377   : > { %3702 = vmatprep.subr.mxu0 %v4005_v37  ;;  %v2557_v54 = vsel %vm541_vm0, %v4937_v36, %v2555_v35 }
 0x378   : > { %2574 = vrot.lane.b32.xlu0 %v2249_v59, %s4002_s30 }
 0x379   : > { %v2245_v38 = vld [vmem:[#allocation2] sm:$0xff] }
 0x37a   : > { %2566 = vrot.lane.b32.xlu1 %v2245_v38, %s4002_s30  ;;  %3703 = vmatpush3.msra.mxu0 %v2245_v38 }
 0x37b   : > { %3705 = vmatmul.mubr.msk.f32.vlgmr.msra.gmra.mxu0 %vm2253_vm13, %v2244_v40  ;;  %3726 = vmatprep.subr.mxu0 %v4005_v37 }
 0x37c   : > { %3236 = vrot.lane.b32.xlu0 %v2252_v41, %s4003_s8  ;;  %3742 = vmatprep.mubr.msk.f32.mxu0 %vm4008_vm12, %v4005_v37 }
 0x37e   : > { %2572 = vrot.lane.b32.xlu1 %v2248_v44, %s4002_s30 }
 0x380   : > { %2578 = vrot.lane.b32.xlu0 %v2251_v24, %s4002_s30 }
 0x382   : > { %2576 = vrot.lane.b32.xlu1 %v2250_v26, %s4002_s30 }
 0x384   : > { %3230 = vrot.lane.b32.xlu0 %v2249_v59, %s4003_s8 }
 0x386   : > { %2904 = vrot.lane.b32.xlu1 %v2250_v26, %s4001_s28 }
 0x388   : > { %3228 = vrot.lane.b32.xlu0 %v2248_v44, %s4003_s8 }
 0x38a   : > { %2580 = vrot.lane.b32.xlu1 %v2252_v41, %s4002_s30  ;;  %s3557_s30 = sshll.u32 %s3980_s24, 7  ;;  %s4009_s24 = smov [#allocation3]  }
 0x38b   : > { %s5180_s16 = scalar_lea.hbm %s5228_s6, %s3557_s30  ;;  %s3916_s19 = sshll.u32 %s4009_s24, 4  ;;  %s3917_s19 = int_to_ptr.vmem [resolvable:$false] %s3916_s19 }
 0x38c   : > { %3226 = vrot.lane.b32.xlu0 %v2247_v3, %s4003_s8 }
 0x38e   : > { %2902 = vrot.lane.b32.xlu1 %v2249_v59, %s4001_s28 }
 0x390   : > { %3234 = vrot.lane.b32.xlu0 %v2251_v24, %s4003_s8 }
 0x392   : > { %2908 = vrot.lane.b32.xlu1 %v2252_v41, %s4001_s28 }
 0x394   : > { %3224 = vrot.lane.b32.xlu0 %v2246_v48, %s4003_s8 }
 0x396   : > { %2900 = vrot.lane.b32.xlu1 %v2248_v44, %s4001_s28 }
 0x398   : > { %2894 = vrot.lane.b32.xlu0 %v2245_v38, %s4001_s28 }
 0x39a   : > { %2906 = vrot.lane.b32.xlu1 %v2251_v24, %s4001_s28 }
 0x39c   : > { %3222 = vrot.lane.b32.xlu0 %v2245_v38, %s4003_s8 }
 0x39e   : > { %2898 = vrot.lane.b32.xlu1 %v2247_v3, %s4001_s28 }
 0x3a2   : > { %2896 = vrot.lane.b32.xlu1 %v2246_v48, %s4001_s28 }
 0x3a6   : > { %2890 = vrot.lane.b32.xlu1 %v2888_v28, %s4000_s27 }
 0x3aa   : > { %3218 = vrot.lane.b32.xlu1 %v3216_v55, %s4000_s27  ;;  %s294_s27 = sand.u32 1, %s3972_s22  }
 0x3ab   : > { %s3451_s28 = sshll.u32 %s294_s27, 3  ;;  %s3336_s17 = scalar_lea.sflag [#allocation4], %s294_s27 }
 0x3ac   : > { %s296_s8 = scalar_lea.vmem [#allocation3], %s3451_s28 }
 0x3ad   : > { %s3349_s14 = sshll.u32 %s296_s8, 4  ;;  %s3350_s14 = int_to_ptr.vmem [resolvable:$true] %s3349_s14 }
 0x3ae   : > { %s3912_s18 = scalar_lea.vmem %s3350_s14, 128  ;;  %p3919_p1 = scmp.lt.s32.totalorder %s3350_s14, %s3917_s19 }
 0x3af   : > { %p3913_p12 = scmp.ne.s32.totalorder %s3350_s14, %s3912_s18 }
 0x3b1   : > { %p3914_p13 = pnand %p3913_p12, %p4085_p4 }
 0x3b3   : > { %p3915_p0 = pneg %p3914_p13 }
 0x3e2   : > { %v2571_v30 = vpop.permute.xlu0 %2570 }
 0x3e6   : > { %v3233_v10 = vpop.permute.xlu0 %3232 }
 0x3e8   : > { %v2569_v52 = vpop.permute.xlu1 %2568 }
 0x3ea   : > { %v2575_v56 = vpop.permute.xlu0 %2574 }
 0x3ec   : > { %v2567_v21 = vpop.permute.xlu1 %2566 }
 0x3ee   : > { %v3237_v39 = vpop.permute.xlu0 %3236 }
 0x3f0   : > { %v2573_v25 = vpop.permute.xlu1 %2572 }
 0x3f2   : > { %v2579_v0 = vpop.permute.xlu0 %2578 }
 0x3f4   : > { %v2577_v57 = vpop.permute.xlu1 %2576 }
 0x3f6   : > { %v3231_v15 = vpop.permute.xlu0 %3230 }
 0x3f8   : > { %v2905_v51 = vpop.permute.xlu1 %2904 }
 0x3fa   : > { %v3229_v46 = vpop.permute.xlu0 %3228 }
 0x3fc   : > { %v2581_v22 = vpop.permute.xlu1 %2580 }
 0x3fd   : > { %3708 = vmatpush3.msra.mxu1 %v2581_v22 }
 0x3fe   : > { %3709 = vmatprep.subr.mxu1 %v4005_v37  ;;  %v3227_v29 = vpop.permute.xlu0 %3226 }
 0x3ff   : > { %3710 = vmatpush3.msra.mxu1 %v2579_v0 }
 0x400   : > { %3711 = vmatprep.subr.mxu1 %v4005_v37  ;;  %v2903_v60 = vpop.permute.xlu1 %2902 }
 0x401   : > { %3712 = vmatpush3.msra.mxu1 %v2577_v57 }
 0x402   : > { %3713 = vmatprep.subr.mxu1 %v4005_v37  ;;  %v3235_v14 = vpop.permute.xlu0 %3234 }
 0x403   : > { %3714 = vmatpush3.msra.mxu1 %v2575_v56 }
 0x404   : > { %3715 = vmatprep.subr.mxu1 %v4005_v37  ;;  %v2909_v2 = vpop.permute.xlu1 %2908 }
 0x405   : > { %3716 = vmatpush3.msra.mxu1 %v2573_v25  ;;  %3727 = vmatpush3.msra.mxu0 %v2909_v2 }
 0x406   : > { %3717 = vmatprep.subr.mxu1 %v4005_v37  ;;  %3728 = vmatprep.subr.mxu0 %v4005_v37  ;;  %v3225_v62 = vpop.permute.xlu0 %3224 }
 0x407   : > { %3718 = vmatpush3.msra.mxu1 %v2571_v30 }
 0x408   : > { %3719 = vmatprep.subr.mxu1 %v4005_v37  ;;  %v2901_v34 = vpop.permute.xlu1 %2900 }
 0x409   : > { %3720 = vmatpush3.msra.mxu1 %v2569_v52 }
 0x40a   : > { %3721 = vmatprep.subr.mxu1 %v4005_v37  ;;  %v2895_v18 = vpop.permute.xlu0 %2894 }
 0x40b   : > { %3722 = vmatpush3.msra.mxu1 %v2567_v21 }
 0x40c   : > { %3724 = vmatmul.mubr.msk.f32.vlgmr.msra.gmra.mxu1 %vm2253_vm13, %v2557_v54  ;;  %3745 = vmatprep.subr.mxu1 %v4005_v37  ;;  %v2907_v58 = vpop.permute.xlu1 %2906 }
 0x40d   : > { %3729 = vmatpush3.msra.mxu0 %v2907_v58  ;;  %3746 = vmatpush3.msra.mxu1 %v3237_v39 }
 0x40e   : > { %3730 = vmatprep.subr.mxu0 %v4005_v37  ;;  %3747 = vmatprep.subr.mxu1 %v4005_v37  ;;  %v3223_v31 = vpop.permute.xlu0 %3222 }
 0x40f   : > { %3731 = vmatpush3.msra.mxu0 %v2905_v51  ;;  %3748 = vmatpush3.msra.mxu1 %v3235_v14 }
 0x410   : > { %3732 = vmatprep.subr.mxu0 %v4005_v37  ;;  %3749 = vmatprep.subr.mxu1 %v4005_v37  ;;  %v2899_v36 = vpop.permute.xlu1 %2898 }
 0x411   : > { %3733 = vmatpush3.msra.mxu0 %v2903_v60  ;;  %3750 = vmatpush3.msra.mxu1 %v3233_v10 }
 0x412   : > { %3734 = vmatprep.subr.mxu0 %v4005_v37  ;;  %3751 = vmatprep.subr.mxu1 %v4005_v37 }
 0x413   : > { %3735 = vmatpush3.msra.mxu0 %v2901_v34  ;;  %3752 = vmatpush3.msra.mxu1 %v3231_v15 }
 0x414   : > { %3736 = vmatprep.subr.mxu0 %v4005_v37  ;;  %3753 = vmatprep.subr.mxu1 %v4005_v37  ;;  %v2897_v11 = vpop.permute.xlu1 %2896 }
 0x415   : > { %3737 = vmatpush3.msra.mxu0 %v2899_v36  ;;  %3754 = vmatpush3.msra.mxu1 %v3229_v46 }
 0x416   : > { %3738 = vmatprep.subr.mxu0 %v4005_v37  ;;  %3755 = vmatprep.subr.mxu1 %v4005_v37 }
 0x417   : > { %3739 = vmatpush3.msra.mxu0 %v2897_v11  ;;  %3756 = vmatpush3.msra.mxu1 %v3227_v29 }
 0x418   : > { %3740 = vmatprep.subr.mxu0 %v4005_v37  ;;  %3757 = vmatprep.subr.mxu1 %v4005_v37  ;;  %v2891_v17 = vpop.permute.xlu1 %2890 }
 0x419   : > { %v2893_v6 = vsel %vm541_vm0, %v5009_v45, %v2891_v17  ;;  %3741 = vmatpush3.msra.mxu0 %v2895_v18  ;;  %3758 = vmatpush3.msra.mxu1 %v3225_v62 }
 0x41a   : > { %3743 = vmatmul.mubr.msk.f32.vlgmr.msra.gmra.mxu0 %vm2253_vm13, %v2893_v6  ;;  %3759 = vmatprep.subr.mxu1 %v4005_v37 }
 0x41b   : > { %3760 = vmatpush3.msra.mxu1 %v3223_v31  ;;  %3761 = vmatprep.mubr.msk.f32.mxu1 %vm4008_vm12, %v4005_v37 }
 0x41c   : > { %v3219_v47 = vpop.permute.xlu1 %3218 }
 0x41d   : > { %v3221_v43 = vsel %vm541_vm0, %v5021_v63, %v3219_v47 }
 0x41e   : > { %3762 = vmatmul.mubr.msk.f32.vlgmr.msra.gmra.mxu1 %vm2253_vm13, %v3221_v43 }
 0x43b   : > { %v2323_v45 = vpop.f32.mrf.mxu0 }
 0x43d   : > { %v3706_v42 = vpop.f32.mrf.mxu0 }
 0x4cc   : > { %v2659_v33 = vpop.f32.mrf.mxu1 }
 0x4cd   : > { %3320 = vrot.lane.b32.xlu1 %v2659_v33, %s4004_s20  ;;  %s3918_s20 = scalar_lea.vmem %s3917_s19, 256 }
 0x4ce   : > { %v3725_v13 = vpop.f32.mrf.mxu1  ;;  %p3920_p2 = scmp.lt.s32.totalorder %s3918_s20, %s3912_s18 }
 0x4d0   : > { %p3921_p3 = por %p3920_p2, %p3919_p1 }
 0x4d2   : > { %p3922_p5 = pnand %p3921_p3, %p3915_p0 }
 0x4da   : > { %v2987_v5 = vpop.f32.mrf.mxu0 }
 0x4db   : > { %3324 = vrot.lane.b32.xlu0 %v2987_v5, %s4006_s11 }
 0x4dc   : > { %v3744_v41 = vpop.f32.mrf.mxu0 }
 0x4de   : > { %v3315_v23 = vpop.f32.mrf.mxu1 }
 0x4df   : > { %3328 = vrot.lane.b32.xlu1 %v3315_v23, %s4007_s13 }
 0x4e0   : > { %v3763_v37 = vpop.f32.mrf.mxu1 }
 0x53f   : > { %v3321_v63 = vpop.permute.xlu1 %3320 }
 0x540   : > { %v3331_v49 = vsel %vm575_vm1, %v2323_v45, %v3321_v63 }
 0x54d   : > { %v3325_v4 = vpop.permute.xlu0 %3324 }
 0x54e   : > { %v3332_v24 = vsel %vm1953_vm10, %v3331_v49, %v3325_v4 }
 0x551   : > { %v3329_v8 = vpop.permute.xlu1 %3328 }
 0x552   : > { %v3333_v16 = vsel %vm1962_vm11, %v3332_v24, %v3329_v8 }
 0x553   : > { %3334 = vst.msk [vmem:[%s296_s8] sm:$0xff] %vm541_vm0, %v3333_v16 }
 0x554   : > { %3925 = shalt.err (!%p3922_p5)
}
 0x555   : > { %s3926_s11 = scalar_lea.hbm %s5180_s16, 128  ;;  %s3930_s28 = scalar_lea.hbm %s5228_s6, 256 }
 0x556   : > { %p3927_p6 = scmp.ne.s32.totalorder %s5180_s16, %s3926_s11  ;;  %p3931_p10 = scmp.lt.s32.totalorder %s5180_s16, %s5228_s6 }
 0x557   : > { %p3932_p11 = scmp.lt.s32.totalorder %s3930_s28, %s3926_s11 }
 0x558   : > { %p3928_p7 = pnand %p3927_p6, %p4085_p4 }
 0x559   : > { %p3933_p12 = por %p3932_p11, %p3931_p10 }
 0x55a   : > { %p3929_p9 = pneg %p3928_p7 }
 0x55c   : > { %p3934_p13 = pnand %p3933_p12, %p3929_p9 }
 0x55e   : > { %3937 = shalt.err (!%p3934_p13)
}
 0x55f   : > { %3796 = dma.vmem_to_hbm [thread:$0]  (%p4085_p4), %s3350_s14, 128, %s5180_s16, %s3336_s17  }
 0x560 PF: > { %p3802_p0 = scmp.ge.s32.totalorder %s3988_s26, 2  ;;  %s3361_s12 = sand.u32 1, %s3968_s21  }
 0x561   : > { %s3362_s15 = scalar_lea.sflag [#allocation4], %s3361_s12 }
 0x562   : > { %p3799_p1 = pnand %p3802_p0, %p4092_p8 }
 0x564   : > { %p3800_p2 = pneg %p3799_p1 }
 0x566   : > { %3963 = dma.done.wait (%p3800_p2), %s3362_s15, 128  }
 0x567   : > { %3965 = vsyncadd (%p3800_p2), %s3362_s15, 4294967168  ;;  %s19_s26 = sadd.s32 1, %s3988_s26   ;;  %s5243_s21 = smov %s3972_s22 }
 0x568   : > { %p16_p3 = scmp.ge.s32.totalorder %s19_s26, 4   ;;  %s5244_s22 = smov %s3976_s23 }
 0x569   : > { %s5245_s23 = smov %s4098_s10  ;;  %s5246_s24 = smov %s3984_s25 }
 0x56a   : > { %s5247_s25 = smov %s5249_s29  ;;  %18 = sbr.rel (!%p16_p3) target bundleno = 4 (0x4), region = 93 }
 0x56f   :  { %3367 = vsyncpa [#allocation4], 1 }
 0x570   :  { %3369 = vsyncpa [#allocation4 + $0x1], 1 }

</bundles_post_ra>
